<compile_context>
chip_gen: v7x
topology: tpu7x:2x2x1
jax: 0.10.0
libtpu: 0.0.40
codegen_flags: <defaults>
</compile_context>

<pallas_src>
import jax
import jax.numpy as jnp
from jax import lax
from jax.experimental import pallas as pl
from jax.experimental.pallas import tpu as pltpu


# ----------------------------- Pallas kernel ---------------------------------
def mamba_block_kernel(x_ref, w_in_ref, conv_w_ref, conv_b_ref, w_x_ref,
                       w_dt_ref, b_dt_ref, a_ref, d_ref, w_out_ref,
                       out_ref,
                       dA_s, st_s):
    x = x_ref[...].astype(jnp.float32)                    # (L, d_model)
    L, d_model = x.shape
    d_state, d_inner = a_ref.shape                        # a_ref = -exp(A_log).T
    d_conv = conv_w_ref.shape[0]
    dt_rank = w_dt_ref.shape[0]

    # --- in_proj (bf16 MXU operands, f32 accumulate) --------------------------
    xr = jnp.dot(x.astype(jnp.bfloat16), w_in_ref[...],
                 preferred_element_type=jnp.float32)      # (L, 2*d_inner)
    xi = xr[:, :d_inner]
    res = xr[:, d_inner:]

    # --- causal depthwise conv1d (padding = d_conv-1, truncated to L) + SiLU ---
    # rolled shift (XLU) + iota mask instead of zero-pad concat / unaligned slices.
    row = lax.broadcasted_iota(jnp.int32, (L, d_inner), 0)
    cw = conv_w_ref[...]                                  # (d_conv, d_inner)
    conv = jnp.broadcast_to(conv_b_ref[...], (L, d_inner))
    for k in range(d_conv):                               # static, tiny kernel size
        xk = pltpu.roll(xi, shift=k, axis=0) if k else xi # row i <- xi[i-k] (wrapped)
        xk = jnp.where(row >= k, xk, 0.0)                 # causal: zero the wrap-around
        conv = conv + xk * cw[d_conv - 1 - k:d_conv - k, :]
    u = conv * jax.nn.sigmoid(conv)                       # SiLU, (L, d_inner), f32

    # --- x_proj, dt_proj, softplus ---------------------------------------------
    x_dbl = jnp.dot(u.astype(jnp.bfloat16), w_x_ref[...],
                    preferred_element_type=jnp.float32)   # (L, dt_rank + 2n)
    delta_r = x_dbl[:, :dt_rank]
    Bm = x_dbl[:, dt_rank:dt_rank + d_state]              # (L, n)
    Cm = x_dbl[:, dt_rank + d_state:]                     # (L, n)
    dt = jnp.dot(delta_r.astype(jnp.bfloat16), w_dt_ref[...],
                 preferred_element_type=jnp.float32) + b_dt_ref[...]
    delta = jnp.where(dt > 20.0, dt,
                      jnp.log1p(jnp.exp(jnp.minimum(dt, 20.0))))   # softplus, (L, d_inner)

    # --- bulk precompute of scan coefficients (full-width EUP/VPU work) ---------
    A_T = a_ref[...]                                      # (n, d_inner)
    dA_s[...] = jnp.exp(delta[:, None, :] * A_T[None, :, :])        # (L, n, d_inner)
    st_s[...] = (delta * u)[:, None, :] * Bm[:, :, None]            # dB*u; reused below

    # --- selective scan: state carried in registers; trajectory overwrites dB*u --
    def scan_step(i, st):
        st = dA_s[i] * st + st_s[i]                       # (n, d_inner)
        st_s[i] = st                                      # dBu_s[i] dead -> store state
        return st

    lax.fori_loop(0, L, scan_step,
                  jnp.zeros((d_state, d_inner), jnp.float32),
                  unroll=True if L <= 16 else 2)

    # --- bulk C-contraction + skip connection ------------------------------------
    y = jnp.sum(st_s[...] * Cm[:, :, None], axis=1) + u * d_ref[...]   # (L, d_inner)

    # --- gate, out_proj -----------------------------------------------------------
    y = y * (res * jax.nn.sigmoid(res))                   # y * SiLU(res)
    out = jnp.dot(y.astype(jnp.bfloat16), w_out_ref[...],
                  preferred_element_type=jnp.float32)     # (L, d_model)
    out_ref[...] = out.astype(out_ref.dtype)


# ----------------------------- wrapper ---------------------------------------
def mamba_block(x, p):
    b, L, d_model = x.shape
    d_inner, d_state = p["a_log"].shape
    d_conv = p["conv_w"].shape[0]
    dt_rank = p["w_dt"].shape[0]

    # Host-side plumbing (free vs. doing it once per grid step in the kernel):
    a_neg = (-jnp.exp(p["a_log"].astype(jnp.float32))).T          # (d_state, d_inner)
    w_in  = p["w_in"].astype(jnp.bfloat16)                        # MXU operands in bf16
    w_x   = p["w_x"].astype(jnp.bfloat16)
    w_dt  = p["w_dt"].astype(jnp.bfloat16)
    w_out = p["w_out"].astype(jnp.bfloat16)

    full2 = lambda shape: pl.BlockSpec(shape, lambda i: (0, 0))

    return pl.pallas_call(
        mamba_block_kernel,
        out_shape=jax.ShapeDtypeStruct((b, L, d_model), x.dtype),
        grid_spec=pltpu.PrefetchScalarGridSpec(
            num_scalar_prefetch=0,
            grid=(b,),
            in_specs=[
                pl.BlockSpec((None, L, d_model), lambda i: (i, 0, 0)),   # x (batch squeezed)
                full2((d_model, 2 * d_inner)),                           # w_in (bf16)
                full2((d_conv, d_inner)),                                # conv_w (f32)
                full2((1, d_inner)),                                     # conv_b (f32)
                full2((d_inner, dt_rank + 2 * d_state)),                 # w_x (bf16)
                full2((dt_rank, d_inner)),                               # w_dt (bf16)
                full2((1, d_inner)),                                     # b_dt (f32)
                full2((d_state, d_inner)),                               # -exp(A_log).T (f32)
                full2((1, d_inner)),                                     # D (f32)
                full2((d_inner, d_model)),                               # w_out (bf16)
            ],
            out_specs=pl.BlockSpec((None, L, d_model), lambda i: (i, 0, 0)),
            scratch_shapes=[
                pltpu.VMEM((L, d_state, d_inner), jnp.float32),   # dA
                pltpu.VMEM((L, d_state, d_inner), jnp.float32),   # dB*u -> state trajectory
            ],
        ),
        compiler_params=pltpu.CompilerParams(
            dimension_semantics=("parallel",),          # batch iterations are independent
            vmem_limit_bytes=32 * 1024 * 1024,
        ),
    )(x, w_in, p["conv_w"], p["conv_b"], w_x, w_dt, p["b_dt"], a_neg, p["D"], w_out)


# ----------------------------- pure-JAX reference -----------------------------
def mamba_block_ref(x, p):
    d_inner, d_state = p["a_log"].shape
    d_conv = p["conv_w"].shape[0]
    dt_rank = p["w_dt"].shape[0]
    L = x.shape[1]

    xr = x @ p["w_in"]
    xi, res = xr[..., :d_inner], xr[..., d_inner:]

    xpad = jnp.pad(xi, ((0, 0), (d_conv - 1, 0), (0, 0)))
    acc = jnp.zeros_like(xi) + p["conv_b"][0]
    for j in range(d_conv):
        acc = acc + xpad[:, j:j + L, :] * p["conv_w"][j]
    u = jax.nn.silu(acc)

    x_dbl = u @ p["w_x"]
    delta_r = x_dbl[..., :dt_rank]
    Bm = x_dbl[..., dt_rank:dt_rank + d_state]
    Cm = x_dbl[..., dt_rank + d_state:]
    delta = jax.nn.softplus(delta_r @ p["w_dt"] + p["b_dt"][0])

    A = -jnp.exp(p["a_log"])
    dA = jnp.exp(jnp.einsum("bld,dn->bldn", delta, A))
    dBu = jnp.einsum("bld,bln,bld->bldn", delta, Bm, u)

    def step(state, inp):
        dA_i, dBu_i, C_i = inp
        state = dA_i * state + dBu_i
        return state, jnp.einsum("bdn,bn->bd", state, C_i)

    state0 = jnp.zeros((x.shape[0], d_inner, d_state), jnp.float32)
    _, ys = jax.lax.scan(step, state0,
                         (dA.transpose(1, 0, 2, 3), dBu.transpose(1, 0, 2, 3),
                          Cm.transpose(1, 0, 2)))
    y = ys.transpose(1, 0, 2) + u * p["D"][0]
    y = y * jax.nn.silu(res)
    return y @ p["w_out"]


# ----------------------------- main -------------------------------------------
if __name__ == "__main__":
    # ModelArgs(d_model=32, expand=2, d_state=16, d_conv=4) -> d_inner=64, dt_rank=2
    batch, L, d_model = 2, 8, 32
    expand, d_state, d_conv = 2, 16, 4
    d_inner = expand * d_model
    dt_rank = -(-d_model // 16)  # ceil(d_model / 16)

    key = jax.random.PRNGKey(0)
    ks = jax.random.split(key, 8)
    scale = 0.05
    params = {
        "w_in":   scale * jax.random.normal(ks[0], (d_model, 2 * d_inner), jnp.float32),
        "conv_w": scale * jax.random.normal(ks[1], (d_conv, d_inner), jnp.float32),
        "conv_b": scale * jax.random.normal(ks[2], (1, d_inner), jnp.float32),
        "w_x":    scale * jax.random.normal(ks[3], (d_inner, dt_rank + 2 * d_state), jnp.float32),
        "w_dt":   scale * jax.random.normal(ks[4], (dt_rank, d_inner), jnp.float32),
        "b_dt":   scale * jax.random.normal(ks[5], (1, d_inner), jnp.float32),
        "a_log":  jnp.log(jnp.broadcast_to(jnp.arange(1, d_state + 1, dtype=jnp.float32),
                                           (d_inner, d_state))),
        "D":      jnp.ones((1, d_inner), jnp.float32),
        "w_out":  scale * jax.random.normal(ks[6], (d_inner, d_model), jnp.float32),
    }
    x = jax.random.normal(ks[7], (batch, L, d_model), jnp.float32)

    out = jax.block_until_ready(mamba_block(x, params))
    ref = jax.block_until_ready(mamba_block_ref(x, params))

    assert out.shape == (batch, L, d_model)
    max_err = float(jnp.max(jnp.abs(out - ref)))
    assert max_err < 1e-2, f"mismatch vs reference: {max_err}"
    print("KERNEL_OK")
</pallas_src>

<mosaic_0001>
module attributes {stable_mosaic.version = 11 : i64} {
  func.func @mamba_block_kernel(%arg0: i32, %arg1: memref<1x8x32xf32, #tpu.memory_space<vmem>>, %arg2: memref<32x128xbf16, #tpu.memory_space<vmem>>, %arg3: memref<4x64xf32, #tpu.memory_space<vmem>>, %arg4: memref<1x64xf32, #tpu.memory_space<vmem>>, %arg5: memref<64x34xbf16, #tpu.memory_space<vmem>>, %arg6: memref<2x64xbf16, #tpu.memory_space<vmem>>, %arg7: memref<1x64xf32, #tpu.memory_space<vmem>>, %arg8: memref<16x64xf32, #tpu.memory_space<vmem>>, %arg9: memref<1x64xf32, #tpu.memory_space<vmem>>, %arg10: memref<64x32xbf16, #tpu.memory_space<vmem>>, %arg11: memref<1x8x32xf32, #tpu.memory_space<vmem>>, %arg12: memref<8x16x64xf32, #tpu.memory_space<vmem>>, %arg13: memref<8x16x64xf32, #tpu.memory_space<vmem>>) attributes {dimension_semantics = [#tpu.dimension_semantics<parallel>], iteration_bounds = array<i64: 2>, scalar_prefetch = 0 : i64, scratch_operands = 2 : i64, tpu.core_type = #tpu.core_type<tc>, window_params = [{transform_indices = @transform_0, window_bounds = array<i64: 1, 8, 32>}, {pipeline_mode = #tpu.pipeline_mode<synchronous>, transform_indices = @transform_1, window_bounds = array<i64: 32, 128>}, {pipeline_mode = #tpu.pipeline_mode<synchronous>, transform_indices = @transform_2, window_bounds = array<i64: 4, 64>}, {pipeline_mode = #tpu.pipeline_mode<synchronous>, transform_indices = @transform_3, window_bounds = array<i64: 1, 64>}, {pipeline_mode = #tpu.pipeline_mode<synchronous>, transform_indices = @transform_4, window_bounds = array<i64: 64, 34>}, {pipeline_mode = #tpu.pipeline_mode<synchronous>, transform_indices = @transform_5, window_bounds = array<i64: 2, 64>}, {pipeline_mode = #tpu.pipeline_mode<synchronous>, transform_indices = @transform_6, window_bounds = array<i64: 1, 64>}, {pipeline_mode = #tpu.pipeline_mode<synchronous>, transform_indices = @transform_7, window_bounds = array<i64: 16, 64>}, {pipeline_mode = #tpu.pipeline_mode<synchronous>, transform_indices = @transform_8, window_bounds = array<i64: 1, 64>}, {pipeline_mode = #tpu.pipeline_mode<synchronous>, transform_indices = @transform_9, window_bounds = array<i64: 64, 32>}, {transform_indices = @transform_10, window_bounds = array<i64: 1, 8, 32>}]} {
    %c0 = arith.constant 0 : index
    %c0_0 = arith.constant 0 : index
    %c0_1 = arith.constant 0 : index
    %0 = vector.load %arg1[%c0, %c0_0, %c0_1] : memref<1x8x32xf32, #tpu.memory_space<vmem>>, vector<1x8x32xf32>
    %1 = vector.shape_cast %0 : vector<1x8x32xf32> to vector<8x32xf32>
    %2 = arith.truncf %1 : vector<8x32xf32> to vector<8x32xbf16>
    %c0_2 = arith.constant 0 : index
    %c0_3 = arith.constant 0 : index
    %3 = vector.load %arg2[%c0_2, %c0_3] : memref<32x128xbf16, #tpu.memory_space<vmem>>, vector<32x128xbf16>
    %cst = arith.constant dense<0.000000e+00> : vector<8x128xf32>
    %4 = tpu.matmul %2, %3, %cst {dimension_numbers = #tpu.dot_dimension_numbers<[1], [0], [0], [1], [0, 0, 1, 1], [], []>} : vector<8x32xbf16>, vector<32x128xbf16>, vector<8x128xf32> -> vector<8x128xf32>
    %5 = vector.extract_strided_slice %4 {offsets = [0, 0], sizes = [8, 64], strides = [1, 1]} : vector<8x128xf32> to vector<8x64xf32>
    %6 = vector.extract_strided_slice %4 {offsets = [0, 64], sizes = [8, 64], strides = [1, 1]} : vector<8x128xf32> to vector<8x64xf32>
    %7 = tpu.iota {dimensions = array<i32: 0>} : vector<8x64xi32>
    %c0_4 = arith.constant 0 : index
    %c0_5 = arith.constant 0 : index
    %8 = vector.load %arg3[%c0_4, %c0_5] : memref<4x64xf32, #tpu.memory_space<vmem>>, vector<4x64xf32>
    %c0_6 = arith.constant 0 : index
    %c0_7 = arith.constant 0 : index
    %9 = vector.load %arg4[%c0_6, %c0_7] : memref<1x64xf32, #tpu.memory_space<vmem>>, vector<1x64xf32>
    %10 = vector.shape_cast %9 : vector<1x64xf32> to vector<1x64xf32>
    %11 = vector.broadcast %10 : vector<1x64xf32> to vector<8x64xf32>
    %c0_i32 = arith.constant 0 : i32
    %12 = vector.broadcast %c0_i32 : i32 to vector<8x64xi32>
    %13 = arith.cmpi sge, %7, %12 : vector<8x64xi32>
    %cst_8 = arith.constant 0.000000e+00 : f32
    %14 = vector.broadcast %cst_8 : f32 to vector<8x64xf32>
    %15 = arith.select %13, %5, %14 : vector<8x64xi1>, vector<8x64xf32>
    %16 = vector.extract_strided_slice %8 {offsets = [3, 0], sizes = [1, 64], strides = [1, 1]} : vector<4x64xf32> to vector<1x64xf32>
    %17 = vector.broadcast %16 : vector<1x64xf32> to vector<8x64xf32>
    %18 = arith.mulf %15, %17 : vector<8x64xf32>
    %19 = arith.addf %11, %18 : vector<8x64xf32>
    %c1_i32 = arith.constant 1 : i32
    %20 = tpu.dynamic_rotate %5 by %c1_i32 dim 0 : vector<8x64xf32>, i32 -> vector<8x64xf32>
    %c1_i32_9 = arith.constant 1 : i32
    %21 = vector.broadcast %c1_i32_9 : i32 to vector<8x64xi32>
    %22 = arith.cmpi sge, %7, %21 : vector<8x64xi32>
    %cst_10 = arith.constant 0.000000e+00 : f32
    %23 = vector.broadcast %cst_10 : f32 to vector<8x64xf32>
    %24 = arith.select %22, %20, %23 : vector<8x64xi1>, vector<8x64xf32>
    %25 = vector.extract_strided_slice %8 {offsets = [2, 0], sizes = [1, 64], strides = [1, 1]} : vector<4x64xf32> to vector<1x64xf32>
    %26 = vector.broadcast %25 : vector<1x64xf32> to vector<8x64xf32>
    %27 = arith.mulf %24, %26 : vector<8x64xf32>
    %28 = arith.addf %19, %27 : vector<8x64xf32>
    %c2_i32 = arith.constant 2 : i32
    %29 = tpu.dynamic_rotate %5 by %c2_i32 dim 0 : vector<8x64xf32>, i32 -> vector<8x64xf32>
    %c2_i32_11 = arith.constant 2 : i32
    %30 = vector.broadcast %c2_i32_11 : i32 to vector<8x64xi32>
    %31 = arith.cmpi sge, %7, %30 : vector<8x64xi32>
    %cst_12 = arith.constant 0.000000e+00 : f32
    %32 = vector.broadcast %cst_12 : f32 to vector<8x64xf32>
    %33 = arith.select %31, %29, %32 : vector<8x64xi1>, vector<8x64xf32>
    %34 = vector.extract_strided_slice %8 {offsets = [1, 0], sizes = [1, 64], strides = [1, 1]} : vector<4x64xf32> to vector<1x64xf32>
    %35 = vector.broadcast %34 : vector<1x64xf32> to vector<8x64xf32>
    %36 = arith.mulf %33, %35 : vector<8x64xf32>
    %37 = arith.addf %28, %36 : vector<8x64xf32>
    %c3_i32 = arith.constant 3 : i32
    %38 = tpu.dynamic_rotate %5 by %c3_i32 dim 0 : vector<8x64xf32>, i32 -> vector<8x64xf32>
    %c3_i32_13 = arith.constant 3 : i32
    %39 = vector.broadcast %c3_i32_13 : i32 to vector<8x64xi32>
    %40 = arith.cmpi sge, %7, %39 : vector<8x64xi32>
    %cst_14 = arith.constant 0.000000e+00 : f32
    %41 = vector.broadcast %cst_14 : f32 to vector<8x64xf32>
    %42 = arith.select %40, %38, %41 : vector<8x64xi1>, vector<8x64xf32>
    %43 = vector.extract_strided_slice %8 {offsets = [0, 0], sizes = [1, 64], strides = [1, 1]} : vector<4x64xf32> to vector<1x64xf32>
    %44 = vector.broadcast %43 : vector<1x64xf32> to vector<8x64xf32>
    %45 = arith.mulf %42, %44 : vector<8x64xf32>
    %46 = arith.addf %37, %45 : vector<8x64xf32>
    %47 = arith.negf %46 : vector<8x64xf32>
    %48 = math.exp %47 : vector<8x64xf32>
    %cst_15 = arith.constant 1.000000e+00 : f32
    %49 = vector.broadcast %cst_15 : f32 to vector<8x64xf32>
    %50 = arith.addf %49, %48 : vector<8x64xf32>
    %51 = arith.divf %49, %50 : vector<8x64xf32>
    %52 = arith.mulf %46, %51 : vector<8x64xf32>
    %53 = arith.truncf %52 : vector<8x64xf32> to vector<8x64xbf16>
    %c0_16 = arith.constant 0 : index
    %c0_17 = arith.constant 0 : index
    %54 = vector.load %arg5[%c0_16, %c0_17] : memref<64x34xbf16, #tpu.memory_space<vmem>>, vector<64x34xbf16>
    %cst_18 = arith.constant dense<0.000000e+00> : vector<8x34xf32>
    %55 = tpu.matmul %53, %54, %cst_18 {dimension_numbers = #tpu.dot_dimension_numbers<[1], [0], [0], [1], [0, 0, 1, 1], [], []>} : vector<8x64xbf16>, vector<64x34xbf16>, vector<8x34xf32> -> vector<8x34xf32>
    %56 = vector.extract_strided_slice %55 {offsets = [0, 0], sizes = [8, 2], strides = [1, 1]} : vector<8x34xf32> to vector<8x2xf32>
    %57 = vector.extract_strided_slice %55 {offsets = [0, 2], sizes = [8, 16], strides = [1, 1]} : vector<8x34xf32> to vector<8x16xf32>
    %58 = vector.extract_strided_slice %55 {offsets = [0, 18], sizes = [8, 16], strides = [1, 1]} : vector<8x34xf32> to vector<8x16xf32>
    %59 = arith.truncf %56 : vector<8x2xf32> to vector<8x2xbf16>
    %c0_19 = arith.constant 0 : index
    %c0_20 = arith.constant 0 : index
    %60 = vector.load %arg6[%c0_19, %c0_20] : memref<2x64xbf16, #tpu.memory_space<vmem>>, vector<2x64xbf16>
    %cst_21 = arith.constant dense<0.000000e+00> : vector<8x64xf32>
    %61 = tpu.matmul %59, %60, %cst_21 {dimension_numbers = #tpu.dot_dimension_numbers<[1], [0], [0], [1], [0, 0, 1, 1], [], []>} : vector<8x2xbf16>, vector<2x64xbf16>, vector<8x64xf32> -> vector<8x64xf32>
    %c0_22 = arith.constant 0 : index
    %c0_23 = arith.constant 0 : index
    %62 = vector.load %arg7[%c0_22, %c0_23] : memref<1x64xf32, #tpu.memory_space<vmem>>, vector<1x64xf32>
    %63 = vector.broadcast %62 : vector<1x64xf32> to vector<8x64xf32>
    %64 = arith.addf %61, %63 : vector<8x64xf32>
    %cst_24 = arith.constant 2.000000e+01 : f32
    %65 = vector.broadcast %cst_24 : f32 to vector<8x64xf32>
    %66 = arith.cmpf ogt, %64, %65 : vector<8x64xf32>
    %cst_25 = arith.constant 2.000000e+01 : f32
    %67 = vector.broadcast %cst_25 : f32 to vector<8x64xf32>
    %68 = arith.minimumf %64, %67 : vector<8x64xf32>
    %69 = math.exp %68 : vector<8x64xf32>
    %70 = math.log1p %69 : vector<8x64xf32>
    %71 = arith.select %66, %64, %70 : vector<8x64xi1>, vector<8x64xf32>
    %c0_26 = arith.constant 0 : index
    %c0_27 = arith.constant 0 : index
    %72 = vector.load %arg8[%c0_26, %c0_27] : memref<16x64xf32, #tpu.memory_space<vmem>>, vector<16x64xf32>
    %73 = vector.shape_cast %71 : vector<8x64xf32> to vector<8x1x64xf32>
    %74 = vector.shape_cast %72 : vector<16x64xf32> to vector<1x16x64xf32>
    %75 = vector.broadcast %73 : vector<8x1x64xf32> to vector<8x16x64xf32>
    %76 = vector.broadcast %74 : vector<1x16x64xf32> to vector<8x16x64xf32>
    %77 = arith.mulf %75, %76 : vector<8x16x64xf32>
    %78 = math.exp %77 : vector<8x16x64xf32>
    %c0_28 = arith.constant 0 : index
    %c0_29 = arith.constant 0 : index
    %c0_30 = arith.constant 0 : index
    %79 = vector.load %arg12[%c0_28, %c0_29, %c0_30] : memref<8x16x64xf32, #tpu.memory_space<vmem>>, vector<8x16x64xf32>
    tpu.vector_store %arg12[%c0_28, %c0_29, %c0_30], %78 {strides = array<i32>} : memref<8x16x64xf32, #tpu.memory_space<vmem>>, vector<8x16x64xf32>,
    %80 = arith.mulf %71, %52 : vector<8x64xf32>
    %81 = vector.shape_cast %80 : vector<8x64xf32> to vector<8x1x64xf32>
    %82 = vector.shape_cast %57 : vector<8x16xf32> to vector<8x16x1xf32>
    %83 = vector.broadcast %81 : vector<8x1x64xf32> to vector<8x16x64xf32>
    %84 = vector.broadcast %82 : vector<8x16x1xf32> to vector<8x16x64xf32>
    %85 = arith.mulf %83, %84 : vector<8x16x64xf32>
    %c0_31 = arith.constant 0 : index
    %c0_32 = arith.constant 0 : index
    %c0_33 = arith.constant 0 : index
    %86 = vector.load %arg13[%c0_31, %c0_32, %c0_33] : memref<8x16x64xf32, #tpu.memory_space<vmem>>, vector<8x16x64xf32>
    tpu.vector_store %arg13[%c0_31, %c0_32, %c0_33], %85 {strides = array<i32>} : memref<8x16x64xf32, #tpu.memory_space<vmem>>, vector<8x16x64xf32>,
    %cst_34 = arith.constant 0.000000e+00 : f32
    %87 = vector.broadcast %cst_34 : f32 to vector<16x64xf32>
    %c0_i32_35 = arith.constant 0 : i32
    %88 = arith.index_cast %c0_i32_35 : i32 to index
    %c0_36 = arith.constant 0 : index
    %c0_37 = arith.constant 0 : index
    %89 = vector.load %arg12[%88, %c0_36, %c0_37] : memref<8x16x64xf32, #tpu.memory_space<vmem>>, vector<1x16x64xf32>
    %90 = vector.shape_cast %89 : vector<1x16x64xf32> to vector<16x64xf32>
    %91 = arith.mulf %90, %87 : vector<16x64xf32>
    %92 = arith.index_cast %c0_i32_35 : i32 to index
    %c0_38 = arith.constant 0 : index
    %c0_39 = arith.constant 0 : index
    %93 = vector.load %arg13[%92, %c0_38, %c0_39] : memref<8x16x64xf32, #tpu.memory_space<vmem>>, vector<1x16x64xf32>
    %94 = vector.shape_cast %93 : vector<1x16x64xf32> to vector<16x64xf32>
    %95 = arith.addf %91, %94 : vector<16x64xf32>
    %96 = arith.index_cast %c0_i32_35 : i32 to index
    %c0_40 = arith.constant 0 : index
    %c0_41 = arith.constant 0 : index
    %97 = vector.load %arg13[%96, %c0_40, %c0_41] : memref<8x16x64xf32, #tpu.memory_space<vmem>>, vector<1x16x64xf32>
    %98 = vector.shape_cast %97 : vector<1x16x64xf32> to vector<16x64xf32>
    %99 = vector.shape_cast %95 : vector<16x64xf32> to vector<1x16x64xf32>
    tpu.vector_store %arg13[%96, %c0_40, %c0_41], %99 {strides = array<i32>} : memref<8x16x64xf32, #tpu.memory_space<vmem>>, vector<1x16x64xf32>,
    %c1_i32_42 = arith.constant 1 : i32
    %100 = arith.index_cast %c1_i32_42 : i32 to index
    %c0_43 = arith.constant 0 : index
    %c0_44 = arith.constant 0 : index
    %101 = vector.load %arg12[%100, %c0_43, %c0_44] : memref<8x16x64xf32, #tpu.memory_space<vmem>>, vector<1x16x64xf32>
    %102 = vector.shape_cast %101 : vector<1x16x64xf32> to vector<16x64xf32>
    %103 = arith.mulf %102, %95 : vector<16x64xf32>
    %104 = arith.index_cast %c1_i32_42 : i32 to index
    %c0_45 = arith.constant 0 : index
    %c0_46 = arith.constant 0 : index
    %105 = vector.load %arg13[%104, %c0_45, %c0_46] : memref<8x16x64xf32, #tpu.memory_space<vmem>>, vector<1x16x64xf32>
    %106 = vector.shape_cast %105 : vector<1x16x64xf32> to vector<16x64xf32>
    %107 = arith.addf %103, %106 : vector<16x64xf32>
    %108 = arith.index_cast %c1_i32_42 : i32 to index
    %c0_47 = arith.constant 0 : index
    %c0_48 = arith.constant 0 : index
    %109 = vector.load %arg13[%108, %c0_47, %c0_48] : memref<8x16x64xf32, #tpu.memory_space<vmem>>, vector<1x16x64xf32>
    %110 = vector.shape_cast %109 : vector<1x16x64xf32> to vector<16x64xf32>
    %111 = vector.shape_cast %107 : vector<16x64xf32> to vector<1x16x64xf32>
    tpu.vector_store %arg13[%108, %c0_47, %c0_48], %111 {strides = array<i32>} : memref<8x16x64xf32, #tpu.memory_space<vmem>>, vector<1x16x64xf32>,
    %c2_i32_49 = arith.constant 2 : i32
    %112 = arith.index_cast %c2_i32_49 : i32 to index
    %c0_50 = arith.constant 0 : index
    %c0_51 = arith.constant 0 : index
    %113 = vector.load %arg12[%112, %c0_50, %c0_51] : memref<8x16x64xf32, #tpu.memory_space<vmem>>, vector<1x16x64xf32>
    %114 = vector.shape_cast %113 : vector<1x16x64xf32> to vector<16x64xf32>
    %115 = arith.mulf %114, %107 : vector<16x64xf32>
    %116 = arith.index_cast %c2_i32_49 : i32 to index
    %c0_52 = arith.constant 0 : index
    %c0_53 = arith.constant 0 : index
    %117 = vector.load %arg13[%116, %c0_52, %c0_53] : memref<8x16x64xf32, #tpu.memory_space<vmem>>, vector<1x16x64xf32>
    %118 = vector.shape_cast %117 : vector<1x16x64xf32> to vector<16x64xf32>
    %119 = arith.addf %115, %118 : vector<16x64xf32>
    %120 = arith.index_cast %c2_i32_49 : i32 to index
    %c0_54 = arith.constant 0 : index
    %c0_55 = arith.constant 0 : index
    %121 = vector.load %arg13[%120, %c0_54, %c0_55] : memref<8x16x64xf32, #tpu.memory_space<vmem>>, vector<1x16x64xf32>
    %122 = vector.shape_cast %121 : vector<1x16x64xf32> to vector<16x64xf32>
    %123 = vector.shape_cast %119 : vector<16x64xf32> to vector<1x16x64xf32>
    tpu.vector_store %arg13[%120, %c0_54, %c0_55], %123 {strides = array<i32>} : memref<8x16x64xf32, #tpu.memory_space<vmem>>, vector<1x16x64xf32>,
    %c3_i32_56 = arith.constant 3 : i32
    %124 = arith.index_cast %c3_i32_56 : i32 to index
    %c0_57 = arith.constant 0 : index
    %c0_58 = arith.constant 0 : index
    %125 = vector.load %arg12[%124, %c0_57, %c0_58] : memref<8x16x64xf32, #tpu.memory_space<vmem>>, vector<1x16x64xf32>
    %126 = vector.shape_cast %125 : vector<1x16x64xf32> to vector<16x64xf32>
    %127 = arith.mulf %126, %119 : vector<16x64xf32>
    %128 = arith.index_cast %c3_i32_56 : i32 to index
    %c0_59 = arith.constant 0 : index
    %c0_60 = arith.constant 0 : index
    %129 = vector.load %arg13[%128, %c0_59, %c0_60] : memref<8x16x64xf32, #tpu.memory_space<vmem>>, vector<1x16x64xf32>
    %130 = vector.shape_cast %129 : vector<1x16x64xf32> to vector<16x64xf32>
    %131 = arith.addf %127, %130 : vector<16x64xf32>
    %132 = arith.index_cast %c3_i32_56 : i32 to index
    %c0_61 = arith.constant 0 : index
    %c0_62 = arith.constant 0 : index
    %133 = vector.load %arg13[%132, %c0_61, %c0_62] : memref<8x16x64xf32, #tpu.memory_space<vmem>>, vector<1x16x64xf32>
    %134 = vector.shape_cast %133 : vector<1x16x64xf32> to vector<16x64xf32>
    %135 = vector.shape_cast %131 : vector<16x64xf32> to vector<1x16x64xf32>
    tpu.vector_store %arg13[%132, %c0_61, %c0_62], %135 {strides = array<i32>} : memref<8x16x64xf32, #tpu.memory_space<vmem>>, vector<1x16x64xf32>,
    %c4_i32 = arith.constant 4 : i32
    %136 = arith.index_cast %c4_i32 : i32 to index
    %c0_63 = arith.constant 0 : index
    %c0_64 = arith.constant 0 : index
    %137 = vector.load %arg12[%136, %c0_63, %c0_64] : memref<8x16x64xf32, #tpu.memory_space<vmem>>, vector<1x16x64xf32>
    %138 = vector.shape_cast %137 : vector<1x16x64xf32> to vector<16x64xf32>
    %139 = arith.mulf %138, %131 : vector<16x64xf32>
    %140 = arith.index_cast %c4_i32 : i32 to index
    %c0_65 = arith.constant 0 : index
    %c0_66 = arith.constant 0 : index
    %141 = vector.load %arg13[%140, %c0_65, %c0_66] : memref<8x16x64xf32, #tpu.memory_space<vmem>>, vector<1x16x64xf32>
    %142 = vector.shape_cast %141 : vector<1x16x64xf32> to vector<16x64xf32>
    %143 = arith.addf %139, %142 : vector<16x64xf32>
    %144 = arith.index_cast %c4_i32 : i32 to index
    %c0_67 = arith.constant 0 : index
    %c0_68 = arith.constant 0 : index
    %145 = vector.load %arg13[%144, %c0_67, %c0_68] : memref<8x16x64xf32, #tpu.memory_space<vmem>>, vector<1x16x64xf32>
    %146 = vector.shape_cast %145 : vector<1x16x64xf32> to vector<16x64xf32>
    %147 = vector.shape_cast %143 : vector<16x64xf32> to vector<1x16x64xf32>
    tpu.vector_store %arg13[%144, %c0_67, %c0_68], %147 {strides = array<i32>} : memref<8x16x64xf32, #tpu.memory_space<vmem>>, vector<1x16x64xf32>,
    %c5_i32 = arith.constant 5 : i32
    %148 = arith.index_cast %c5_i32 : i32 to index
    %c0_69 = arith.constant 0 : index
    %c0_70 = arith.constant 0 : index
    %149 = vector.load %arg12[%148, %c0_69, %c0_70] : memref<8x16x64xf32, #tpu.memory_space<vmem>>, vector<1x16x64xf32>
    %150 = vector.shape_cast %149 : vector<1x16x64xf32> to vector<16x64xf32>
    %151 = arith.mulf %150, %143 : vector<16x64xf32>
    %152 = arith.index_cast %c5_i32 : i32 to index
    %c0_71 = arith.constant 0 : index
    %c0_72 = arith.constant 0 : index
    %153 = vector.load %arg13[%152, %c0_71, %c0_72] : memref<8x16x64xf32, #tpu.memory_space<vmem>>, vector<1x16x64xf32>
    %154 = vector.shape_cast %153 : vector<1x16x64xf32> to vector<16x64xf32>
    %155 = arith.addf %151, %154 : vector<16x64xf32>
    %156 = arith.index_cast %c5_i32 : i32 to index
    %c0_73 = arith.constant 0 : index
    %c0_74 = arith.constant 0 : index
    %157 = vector.load %arg13[%156, %c0_73, %c0_74] : memref<8x16x64xf32, #tpu.memory_space<vmem>>, vector<1x16x64xf32>
    %158 = vector.shape_cast %157 : vector<1x16x64xf32> to vector<16x64xf32>
    %159 = vector.shape_cast %155 : vector<16x64xf32> to vector<1x16x64xf32>
    tpu.vector_store %arg13[%156, %c0_73, %c0_74], %159 {strides = array<i32>} : memref<8x16x64xf32, #tpu.memory_space<vmem>>, vector<1x16x64xf32>,
    %c6_i32 = arith.constant 6 : i32
    %160 = arith.index_cast %c6_i32 : i32 to index
    %c0_75 = arith.constant 0 : index
    %c0_76 = arith.constant 0 : index
    %161 = vector.load %arg12[%160, %c0_75, %c0_76] : memref<8x16x64xf32, #tpu.memory_space<vmem>>, vector<1x16x64xf32>
    %162 = vector.shape_cast %161 : vector<1x16x64xf32> to vector<16x64xf32>
    %163 = arith.mulf %162, %155 : vector<16x64xf32>
    %164 = arith.index_cast %c6_i32 : i32 to index
    %c0_77 = arith.constant 0 : index
    %c0_78 = arith.constant 0 : index
    %165 = vector.load %arg13[%164, %c0_77, %c0_78] : memref<8x16x64xf32, #tpu.memory_space<vmem>>, vector<1x16x64xf32>
    %166 = vector.shape_cast %165 : vector<1x16x64xf32> to vector<16x64xf32>
    %167 = arith.addf %163, %166 : vector<16x64xf32>
    %168 = arith.index_cast %c6_i32 : i32 to index
    %c0_79 = arith.constant 0 : index
    %c0_80 = arith.constant 0 : index
    %169 = vector.load %arg13[%168, %c0_79, %c0_80] : memref<8x16x64xf32, #tpu.memory_space<vmem>>, vector<1x16x64xf32>
    %170 = vector.shape_cast %169 : vector<1x16x64xf32> to vector<16x64xf32>
    %171 = vector.shape_cast %167 : vector<16x64xf32> to vector<1x16x64xf32>
    tpu.vector_store %arg13[%168, %c0_79, %c0_80], %171 {strides = array<i32>} : memref<8x16x64xf32, #tpu.memory_space<vmem>>, vector<1x16x64xf32>,
    %c7_i32 = arith.constant 7 : i32
    %172 = arith.index_cast %c7_i32 : i32 to index
    %c0_81 = arith.constant 0 : index
    %c0_82 = arith.constant 0 : index
    %173 = vector.load %arg12[%172, %c0_81, %c0_82] : memref<8x16x64xf32, #tpu.memory_space<vmem>>, vector<1x16x64xf32>
    %174 = vector.shape_cast %173 : vector<1x16x64xf32> to vector<16x64xf32>
    %175 = arith.mulf %174, %167 : vector<16x64xf32>
    %176 = arith.index_cast %c7_i32 : i32 to index
    %c0_83 = arith.constant 0 : index
    %c0_84 = arith.constant 0 : index
    %177 = vector.load %arg13[%176, %c0_83, %c0_84] : memref<8x16x64xf32, #tpu.memory_space<vmem>>, vector<1x16x64xf32>
    %178 = vector.shape_cast %177 : vector<1x16x64xf32> to vector<16x64xf32>
    %179 = arith.addf %175, %178 : vector<16x64xf32>
    %180 = arith.index_cast %c7_i32 : i32 to index
    %c0_85 = arith.constant 0 : index
    %c0_86 = arith.constant 0 : index
    %181 = vector.load %arg13[%180, %c0_85, %c0_86] : memref<8x16x64xf32, #tpu.memory_space<vmem>>, vector<1x16x64xf32>
    %182 = vector.shape_cast %181 : vector<1x16x64xf32> to vector<16x64xf32>
    %183 = vector.shape_cast %179 : vector<16x64xf32> to vector<1x16x64xf32>
    tpu.vector_store %arg13[%180, %c0_85, %c0_86], %183 {strides = array<i32>} : memref<8x16x64xf32, #tpu.memory_space<vmem>>, vector<1x16x64xf32>,
    %c8_i32 = arith.constant 8 : i32
    %c0_87 = arith.constant 0 : index
    %c0_88 = arith.constant 0 : index
    %c0_89 = arith.constant 0 : index
    %184 = vector.load %arg13[%c0_87, %c0_88, %c0_89] : memref<8x16x64xf32, #tpu.memory_space<vmem>>, vector<8x16x64xf32>
    %185 = vector.shape_cast %58 : vector<8x16xf32> to vector<8x16x1xf32>
    %186 = vector.broadcast %185 : vector<8x16x1xf32> to vector<8x16x64xf32>
    %187 = arith.mulf %184, %186 : vector<8x16x64xf32>
    %cst_90 = arith.constant dense<0.000000e+00> : vector<8x64xf32>
    %188 = vector.multi_reduction <add>, %187, %cst_90 [1] : vector<8x16x64xf32> to vector<8x64xf32>
    %c0_91 = arith.constant 0 : index
    %c0_92 = arith.constant 0 : index
    %189 = vector.load %arg9[%c0_91, %c0_92] : memref<1x64xf32, #tpu.memory_space<vmem>>, vector<1x64xf32>
    %190 = vector.broadcast %189 : vector<1x64xf32> to vector<8x64xf32>
    %191 = arith.mulf %52, %190 : vector<8x64xf32>
    %192 = arith.addf %188, %191 : vector<8x64xf32>
    %193 = arith.negf %6 : vector<8x64xf32>
    %194 = math.exp %193 : vector<8x64xf32>
    %cst_93 = arith.constant 1.000000e+00 : f32
    %195 = vector.broadcast %cst_93 : f32 to vector<8x64xf32>
    %196 = arith.addf %195, %194 : vector<8x64xf32>
    %197 = arith.divf %195, %196 : vector<8x64xf32>
    %198 = arith.mulf %6, %197 : vector<8x64xf32>
    %199 = arith.mulf %192, %198 : vector<8x64xf32>
    %200 = arith.truncf %199 : vector<8x64xf32> to vector<8x64xbf16>
    %c0_94 = arith.constant 0 : index
    %c0_95 = arith.constant 0 : index
    %201 = vector.load %arg10[%c0_94, %c0_95] : memref<64x32xbf16, #tpu.memory_space<vmem>>, vector<64x32xbf16>
    %cst_96 = arith.constant dense<0.000000e+00> : vector<8x32xf32>
    %202 = tpu.matmul %200, %201, %cst_96 {dimension_numbers = #tpu.dot_dimension_numbers<[1], [0], [0], [1], [0, 0, 1, 1], [], []>} : vector<8x64xbf16>, vector<64x32xbf16>, vector<8x32xf32> -> vector<8x32xf32>
    %c0_97 = arith.constant 0 : index
    %c0_98 = arith.constant 0 : index
    %c0_99 = arith.constant 0 : index
    %203 = vector.load %arg11[%c0_97, %c0_98, %c0_99] : memref<1x8x32xf32, #tpu.memory_space<vmem>>, vector<1x8x32xf32>
    %204 = vector.shape_cast %203 : vector<1x8x32xf32> to vector<8x32xf32>
    %205 = vector.shape_cast %202 : vector<8x32xf32> to vector<1x8x32xf32>
    tpu.vector_store %arg11[%c0_97, %c0_98, %c0_99], %205 {strides = array<i32>} : memref<1x8x32xf32, #tpu.memory_space<vmem>>, vector<1x8x32xf32>,
    return
  }
  func.func @transform_0(%arg0: i32) -> (i32, i32, i32) {
    %c0_i32 = arith.constant 0 : i32
    %c0_i32_0 = arith.constant 0 : i32
    %c0_i32_1 = arith.constant 0 : i32
    return %arg0, %c0_i32, %c0_i32_0 : i32, i32, i32
  }
  func.func @transform_1(%arg0: i32) -> (i32, i32) {
    %c0_i32 = arith.constant 0 : i32
    %c0_i32_0 = arith.constant 0 : i32
    %c0_i32_1 = arith.constant 0 : i32
    return %c0_i32, %c0_i32_0 : i32, i32
  }
  func.func @transform_2(%arg0: i32) -> (i32, i32) {
    %c0_i32 = arith.constant 0 : i32
    %c0_i32_0 = arith.constant 0 : i32
    %c0_i32_1 = arith.constant 0 : i32
    return %c0_i32, %c0_i32_0 : i32, i32
  }
  func.func @transform_3(%arg0: i32) -> (i32, i32) {
    %c0_i32 = arith.constant 0 : i32
    %c0_i32_0 = arith.constant 0 : i32
    %c0_i32_1 = arith.constant 0 : i32
    return %c0_i32, %c0_i32_0 : i32, i32
  }
  func.func @transform_4(%arg0: i32) -> (i32, i32) {
    %c0_i32 = arith.constant 0 : i32
    %c0_i32_0 = arith.constant 0 : i32
    %c0_i32_1 = arith.constant 0 : i32
    return %c0_i32, %c0_i32_0 : i32, i32
  }
  func.func @transform_5(%arg0: i32) -> (i32, i32) {
    %c0_i32 = arith.constant 0 : i32
    %c0_i32_0 = arith.constant 0 : i32
    %c0_i32_1 = arith.constant 0 : i32
    return %c0_i32, %c0_i32_0 : i32, i32
  }
  func.func @transform_6(%arg0: i32) -> (i32, i32) {
    %c0_i32 = arith.constant 0 : i32
    %c0_i32_0 = arith.constant 0 : i32
    %c0_i32_1 = arith.constant 0 : i32
    return %c0_i32, %c0_i32_0 : i32, i32
  }
  func.func @transform_7(%arg0: i32) -> (i32, i32) {
    %c0_i32 = arith.constant 0 : i32
    %c0_i32_0 = arith.constant 0 : i32
    %c0_i32_1 = arith.constant 0 : i32
    return %c0_i32, %c0_i32_0 : i32, i32
  }
  func.func @transform_8(%arg0: i32) -> (i32, i32) {
    %c0_i32 = arith.constant 0 : i32
    %c0_i32_0 = arith.constant 0 : i32
    %c0_i32_1 = arith.constant 0 : i32
    return %c0_i32, %c0_i32_0 : i32, i32
  }
  func.func @transform_9(%arg0: i32) -> (i32, i32) {
    %c0_i32 = arith.constant 0 : i32
    %c0_i32_0 = arith.constant 0 : i32
    %c0_i32_1 = arith.constant 0 : i32
    return %c0_i32, %c0_i32_0 : i32, i32
  }
  func.func @transform_10(%arg0: i32) -> (i32, i32, i32) {
    %c0_i32 = arith.constant 0 : i32
    %c0_i32_0 = arith.constant 0 : i32
    %c0_i32_1 = arith.constant 0 : i32
    return %arg0, %c0_i32, %c0_i32_0 : i32, i32, i32
  }
}

</mosaic_0001>

<bundles_post_ra>
// kernel: tpu_custom_call.1
= control target key start
LH: loop header
LB: loop body
LE: loop exit
PB: predicated region body
PF: predicated region fallthrough
CT: control target
= control target key end

     0   :  { %15 = vsyncpa [#allocation5], 0  ;;  %s2232_s0 = inlined_call_operand.vmem [shape: f32[2,8,32], index: 0, kind: input, shape index: {}]   ;;  %s2233_s1 = inlined_call_operand.vmem [shape: bf16[32,128], index: 1, kind: input, shape index: {}]   ;;  %s2234_s2 = inlined_call_operand.vmem [shape: f32[4,64], index: 2, kind: input, shape index: {}]   ;;  %s2235_s3 = inlined_call_operand.vmem [shape: f32[1,64], index: 3, kind: input, shape index: {}]   ;;  %s2236_s4 = inlined_call_operand.vmem [shape: bf16[64,34], index: 4, kind: input, shape index: {}]   ;;  %s2237_s5 = inlined_call_operand.vmem [shape: bf16[2,64], index: 5, kind: input, shape index: {}]   ;;  %s2238_s6 = inlined_call_operand.vmem [shape: f32[1,64], index: 6, kind: input, shape index: {}]   ;;  %s2239_s7 = inlined_call_operand.vmem [shape: f32[16,64], index: 7, kind: input, shape index: {}]   ;;  %s2240_s8 = inlined_call_operand.vmem [shape: f32[1,64], index: 8, kind: input, shape index: {}]   ;;  %s2241_s9 = inlined_call_operand.vmem [shape: bf16[64,32], index: 9, kind: input, shape index: {}]   ;;  %s2242_s10 = inlined_call_operand.hbm [shape: f32[2,8,32], index: 10, kind: output, shape index: {}]  }
   0x1   :  { %17 = vsyncpa [#allocation5 + $0x1], 0  ;;  %s1832_s13 = smov 0   ;;  %s1834_s14 = smov 0  }
   0x2   :  { %s1836_s15 = smov 0   ;;  %s1838_s16 = smov 0  }
   0x3 LB: > { %s1853_s17 = sadd.s32 4294967295, %s1770_s16   ;;  %s1529_s18 = sadd.s32 4294967294, %s1770_s16   ;;  %s1770_s16 = sphi %s1838_s16, %s2248_s16   ;;  %s1766_s15 = sphi %s1836_s15, %s2247_s15   ;;  %s1762_s14 = sphi %s1834_s14, %s2246_s14   ;;  %s1758_s13 = sphi %s1832_s13, %s2245_s13  }
   0x4   : > { %s1857_s19 = sadd.s32 1, %s1770_s16   ;;  %s245_s20 = sadd.s32 1, %s1766_s15 }
   0x5   : > { %s242_s21 = ssub.s32 %s1770_s16, %s1857_s19  ;;  %p255_p0 = scmp.ne.s32.totalorder %s1766_s15, %s1762_s14 }
   0x6   : > { %p243_p1 = scmp.eq.s32.totalorder %s242_s21, 0  ;;  %p256_p2 = scmp.eq.s32.totalorder %s1853_s17, 1 }
   0x7   : > { %p261_p3 = scmp.ne.s32.totalorder %s1762_s14, %s1758_s13  ;;  %p262_p4 = scmp.eq.s32.totalorder %s1529_s18, 1 }
   0x8   : > { %s1868_s22 = scalar_select %p243_p1, %s1766_s15, %s245_s20  }
   0x9   : > { %p1870_p5 = por %p256_p2, %p255_p0  ;;  %p1874_p6 = por %p262_p4, %p261_p3 }
   0xa   : > { %p1532_p7 = scmp.ge.s32.totalorder %s1770_s16, 1  ;;  %p314_p8 = scmp.lt.s32.totalorder %s1770_s16, 3 }
   0xc   : > { %p315_p9 = pnand %p1532_p7, %p314_p8 }
   0xd   : > { %v1654_v0 = vld [vmem:[%s2233_s1] sm:$0xff] (!%p315_p9)   ;;  %v1772_v1 = vmov (!%p315_p9), 0.0   ;;  %v1655_v2 = vld [vmem:[%s2233_s1 + $0x8] sm:$0xff] (!%p315_p9)   ;;  %vm1773_vm0 = vmmov (!%p315_p9), 0   ;;  %p351_p10 = scmp.lt.s32.totalorder (!%p315_p9), %s1853_s17, 1  ;;  %vm374_vm1 = vcmask (!%p315_p9), 261120   ;;  %v418_v9 = vlaneseq (!%p315_p9) }
   0xe   : > { %318 = sbr.rel (%p315_p9) target bundleno = 1073 (0x431), region = 60  ;;  %1573 = vmatprep.subr.bf16.mxu1 (!%p315_p9), %v1772_v1  ;;  %1593 = vmatprep.subr.bf16.mxu0 (!%p315_p9), %v1772_v1  ;;  %v1656_v5 = vld [vmem:[%s2236_s4] sm:$0xff] (!%p315_p9)   ;;  %v1657_v6 = vld [vmem:[%s2236_s4 + $0x8] sm:$0xff] (!%p315_p9)   ;;  %v1658_v7 = vld [vmem:[%s2236_s4 + $0x10] sm:$0xff] (!%p315_p9)   ;;  %vm503_vm5 = vcmask (!%p315_p9), 523264   ;;  %vm560_vm6 = vcmask (!%p315_p9), 1040384  }
   0xf   : > { %1574 = vmatpush3.bf16.msra.mxu1 (!%p315_p9), %v1654_v0  ;;  %1577 = vmatprep.mubr.msk.bf16.mxu1 (!%p315_p9), %vm1773_vm0, %v1772_v1  ;;  %v1659_v8 = vld [vmem:[%s2236_s4 + $0x18] sm:$0xff] (!%p315_p9)   ;;  %v1917_v10 = vshrl.u32 (!%p315_p9), %v418_v9, 7  ;;  %v420_v12 = vld [vmem:[%s2234_s2] sm:$0xf] (!%p315_p9)  ;;  %vm556_vm7 = vcmask (!%p315_p9), 15360   ;;  %s1774_s26 = smov (!%p315_p9), 64  }
  0x10   : > { %1575 = vmatprep.subr.bf16.mxu1 (!%p315_p9), %v1772_v1  ;;  %1595 = vmatprep.mubr.msk.bf16.mxu0 (!%p315_p9), %vm1773_vm0, %v1772_v1  ;;  %v1538_v17 = vld [vmem:[%s2235_s3] ss:$0 sm:$0xff] (!%p315_p9)  ;;  %vm1367_vm10 = vcmask (!%p315_p9), 1041409   ;;  %vm1370_vm11 = vcmask (!%p315_p9), 1042434   ;;  %vm1373_vm12 = vcmask (!%p315_p9), 1043459   ;;  %vm1376_vm13 = vcmask (!%p315_p9), 1044484  }
  0x11   : > { %v432_v11 = vsub.s32 (!%p315_p9), 3, %v1917_v10  ;;  %v441_v13 = vsub.s32 (!%p315_p9), 2, %v1917_v10  ;;  %v450_v15 = vsub.s32 (!%p315_p9), 1, %v1917_v10  ;;  %vm437_vm2 = vcmp.ge.s32.totalorder (!%p315_p9), %v1917_v10, 1  ;;  %v548_v45 = vld [vmem:[%s2237_s5] sm:$0x1] (!%p315_p9) }
  0x12   : > { %vm446_vm3 = vcmp.ge.s32.totalorder (!%p315_p9), %v1917_v10, 2  ;;  %v1935_v19 = vsub.s32 (!%p315_p9), 0, %v1917_v10  ;;  %vm455_vm4 = vcmp.ge.s32.totalorder (!%p315_p9), %v1917_v10, 3  ;;  %v562_v46 = vsel (!%p315_p9), %vm560_vm6, %v548_v45, 0  ;;  %s348_s12 = sand.u32 (!%p315_p9), 1, %s1762_s14   ;;  %s1555_s20 = sshll.u32 (!%p315_p9), %s1853_s17, 7 }
  0x13   : > { %1576 = vmatpush3.bf16.msra.mxu1 (!%p315_p9), %v1655_v2  ;;  %v433_v14 = vrot.slane (!%p315_p9), %v420_v12, %v432_v11  ;;  %v442_v18 = vrot.slane (!%p315_p9), %v420_v12, %v441_v13  ;;  %v451_v25 = vrot.slane (!%p315_p9), %v420_v12, %v450_v15  ;;  %1594 = vmatpush3.bf16.msra.mxu0 (!%p315_p9), %v562_v46  ;;  %v875_v56 = vsub.s32 (!%p315_p9), 4, %v1917_v10  ;;  %s2189_s28 = scalar_lea.hbm (!%p315_p9), %s2242_s10, %s1555_s20 }
  0x14   : > { %1581 = vmatprep.subr.bf16.mxu1 (!%p315_p9), %v1772_v1  ;;  %v460_v32 = vrot.slane (!%p315_p9), %v420_v12, %v1935_v19  ;;  %1599 = vmatprep.subr.bf16.mxu0 (!%p315_p9), %v1772_v1  ;;  %v887_v58 = vsub.s32 (!%p315_p9), 5, %v1917_v10  ;;  %v899_v60 = vsub.s32 (!%p315_p9), 6, %v1917_v10  ;;  %v911_v62 = vsub.s32 (!%p315_p9), 7, %v1917_v10 }
  0x15   : > { %s352_s29 = scalar_select %p351_p10, %s1853_s17, 1  ;;  %vm1379_vm14 = vcmask 1045509   ;;  %vm1382_vm15 = vcmask 1046534  }
  0x16   : > { %s1776_s17 = smov [#allocation4]  }
  0x17   : > { %s1534_s30 = sshll.u32 %s352_s29, 3  ;;  %s1457_s29 = scalar_lea.sflag [#allocation5], %s348_s12 }
  0x18   : > { %s354_s18 = scalar_lea.vmem %s2232_s0, %s1534_s30  ;;  %s1712_s11 = sshll.u32 %s1776_s17, 4  ;;  %s1713_s11 = int_to_ptr.vmem [resolvable:$false] %s1712_s11 }
  0x19   : > { %v356_v3 = vld [vmem:[%s354_s18] sm:$0xff]  ;;  %s1533_s18 = sshll.u32 %s348_s12, 3 }
  0x1a   : > { %v357_v4 = vpack.c.bf16 %v356_v3, %v356_v3  ;;  %s350_s21 = scalar_lea.vmem [#allocation4], %s1533_s18  ;;  %s1714_s18 = scalar_lea.vmem %s1713_s11, 256 }
  0x1b   : > { %s1470_s25 = sshll.u32 %s350_s21, 4  ;;  %s2191_s25 = int_to_ptr.vmem [resolvable:$true] %s1470_s25 }
  0x1c   : > { %1578 = vmatmul.mubr.msk.bf16.vlgmr.msra.gmra.mrb[0].mxu1 %vm374_vm1, %v357_v4  ;;  %s1708_s30 = scalar_lea.vmem %s2191_s25, 128  ;;  %p1715_p0 = scmp.lt.s32.totalorder %s2191_s25, %s1713_s11 }
  0x1d   : > { %1589 = vmatprep.mubr.msk.bf16.mxu1 %vm1773_vm0, %v1772_v1  ;;  %1582 = vmatpush3.bf16.msra.mxu1 %v1656_v5  ;;  %p1709_p11 = scmp.ne.s32.totalorder %s2191_s25, %s1708_s30  ;;  %p1716_p1 = scmp.lt.s32.totalorder %s1714_s18, %s1708_s30 }
  0x1e   : > { %1583 = vmatprep.subr.bf16.mxu1 %v1772_v1 }
  0x1f   : > { %p1710_p12 = pnand %p1709_p11, %p1870_p5  ;;  %p1717_p2 = por %p1716_p1, %p1715_p0 }
  0x21   : > { %1584 = vmatpush3.bf16.msra.mxu1 %v1657_v6  ;;  %p1711_p13 = pneg %p1710_p12 }
  0x22   : > { %1585 = vmatprep.subr.bf16.mxu1 %v1772_v1 }
  0x23   : > { %p1718_p3 = pnand %p1717_p2, %p1711_p13 }
  0x25   : > { %1586 = vmatpush3.bf16.msra.mxu1 %v1658_v7 }
  0x26   : > { %1587 = vmatprep.subr.bf16.mxu1 %v1772_v1 }
  0x29   : > { %1588 = vmatpush3.bf16.msra.mxu1 %v1659_v8 }
  0xef   : > { %v1927_v16 = vpop.f32.mrb[0].mxu1 }
  0xf0   : > { %v434_v20 = vmul.f32 %v433_v14, %v1927_v16  ;;  %v436_v21 = vrot.slane %v1927_v16, 7  ;;  %v445_v22 = vrot.slane %v1927_v16, 6  ;;  %v454_v23 = vrot.slane %v1927_v16, 5  ;;  %v1579_v24 = vpop.f32.mrb[1].mxu1  ;;  %v1660_v14 = vld [vmem:[%s2241_s9] sm:$0xff]  }
  0xf1   : > { %v415_v26 = vpop.f32.mrb[2].mxu1  ;;  %v1548_v63 = vmul.f32 -1.442695, %v1927_v16 }
  0xf2   : > { %v435_v27 = vadd.f32 %v1538_v17, %v434_v20  ;;  %v438_v28 = vsel %vm437_vm2, %v436_v21, 0.0  ;;  %v447_v29 = vsel %vm446_vm3, %v445_v22, 0.0  ;;  %v1580_v30 = vpop.f32.mrb[3].mxu1  ;;  %v456_v33 = vsel %vm455_vm4, %v454_v23, 0.0  ;;  %v1663_v17 = vld [vmem:[%s2241_s9 + $0x18] sm:$0xff]  }
  0xf3   : > { %v443_v31 = vmul.f32 %v442_v18, %v438_v28  ;;  %v452_v35 = vmul.f32 %v451_v25, %v447_v29  ;;  %v461_v37 = vmul.f32 %v460_v32, %v456_v33  ;;  %v1545_v18 = vld [vmem:[%s2238_s6] ss:$0 sm:$0xff] }
  0xf5   : > { %v444_v34 = vadd.f32 %v443_v31, %v435_v27 }
  0xf7   : > { %v453_v36 = vadd.f32 %v452_v35, %v444_v34  ;;  %v1775_v35 = vmov 1966171168  }
  0xf9   : > { %v462_v38 = vadd.f32 %v461_v37, %v453_v36  ;;  %v623_v36 = vunpack.c.l.s4 %v1775_v35 }
  0xfb   : > { %v1539_v39 = vmul.f32 -1.442695, %v462_v38 }
  0xfd   : > { %1664 = vpow2.f32 %v1539_v39  ;;  %v624_v39 = vunpack.c.0.s8 %v623_v36 }
  0xff   : > { %v1998_v46 = vsub.s32 %v624_v39, %v1917_v10 }
 0x107   : > { %v1665_v40 = vpop.eup %1664 }
 0x108   : > { %v466_v41 = vadd.f32 1.0, %v1665_v40 }
 0x10a   : > { %1666 = vrcp.f32 %v466_v41 }
 0x10b   : > { %1668 = vpow2.f32 %v1548_v63 }
 0x114   : > { %v1667_v42 = vpop.eup %1666 }
 0x115   : > { %v1943_v43 = vmul.f32 %v1667_v42, %v462_v38  ;;  %v1669_v2 = vpop.eup %1668 }
 0x116   : > { %v1290_v3 = vadd.f32 1.0, %v1669_v2 }
 0x117   : > { %v470_v44 = vpack.c.bf16 %v1943_v43, %v1943_v43 }
 0x118   : > { %1670 = vrcp.f32 %v1290_v3 }
 0x119   : > { %1590 = vmatmul.mubr.msk.bf16.vlgmr.msra.gmra.mrb[4].mxu1 %vm503_vm5, %v470_v44 }
 0x122   : > { %v1671_v4 = vpop.eup %1670 }
 0x123   : > { %v1293_v5 = vmul.f32 %v1671_v4, %v1927_v16  ;;  %v1662_v16 = vld [vmem:[%s2241_s9 + $0x10] sm:$0xff]  }
 0x125   : > { %v1296_v6 = vrot.slane %v1293_v5, 2  ;;  %v1295_v7 = vrot.slane %v1293_v5, 1  ;;  %v1297_v8 = vrot.slane %v1293_v5, 3  ;;  %v1299_v9 = vrot.slane %v1293_v5, 5 }
 0x126   : > { %v1301_v12 = vrot.slane %v1293_v5, 7 }
 0x1ec   : > { %v541_v47 = vpop.f32.mrb[4].mxu1 }
 0x1ed   : > { %v1591_v48 = vpop.f32.mrb[5].mxu1  ;;  %v840_v49 = vrot.slane %v541_v47, %v450_v15  ;;  %v828_v50 = vrot.slane %v541_v47, %v1935_v19  ;;  %v547_v51 = vpack.c.bf16 %v541_v47, %v541_v47  ;;  %v852_v54 = vrot.slane %v541_v47, %v441_v13  ;;  %v1661_v15 = vld [vmem:[%s2241_s9 + $0x8] sm:$0xff]  }
 0x1ee   : > { %v544_v52 = vpop.f32.mrb[6].mxu1  ;;  %v864_v55 = vrot.slane %v541_v47, %v432_v11  ;;  %v876_v57 = vrot.slane %v541_v47, %v875_v56  ;;  %v888_v59 = vrot.slane %v541_v47, %v887_v58  ;;  %v900_v61 = vrot.slane %v541_v47, %v899_v60 }
 0x1ef   : > { %843 = vbcast.lane.b32.xlu1 %v840_v49, 258  ;;  %831 = vbcast.lane.b32.xlu0 %v828_v50, 258  ;;  %v1592_v53 = vpop.f32.mrb[7].mxu1  ;;  %v912_v0 = vrot.slane %v541_v47, %v911_v62  ;;  %v1298_v11 = vrot.slane %v1293_v5, 4  ;;  %v1300_v13 = vrot.slane %v1293_v5, 6 }
 0x1f0   : > { %1596 = vmatmul.mubr.msk.bf16.vlgmr.msra.gmra.mrb[0].mxu0 %vm556_vm7, %v547_v51 }
 0x1f1   : > { %1607 = vmatprep.mubr.msk.bf16.mxu0 %vm1773_vm0, %v1772_v1  ;;  %1600 = vmatpush3.bf16.msra.mxu0 %v1660_v14  ;;  %vm1385_vm0 = vcmask 1047559  }
 0x1f2   : > { %1601 = vmatprep.subr.bf16.mxu0 %v1772_v1 }
 0x1f3   : > { %847 = vbcast.lane.b32.xlu1 %v840_v49, 266  ;;  %835 = vbcast.lane.b32.xlu0 %v828_v50, 266 }
 0x1f5   : > { %1602 = vmatpush3.bf16.msra.mxu0 %v1661_v15 }
 0x1f6   : > { %1603 = vmatprep.subr.bf16.mxu0 %v1772_v1 }
 0x1f7   : > { %859 = vbcast.lane.b32.xlu1 %v852_v54, 266  ;;  %855 = vbcast.lane.b32.xlu0 %v852_v54, 258 }
 0x1f9   : > { %1604 = vmatpush3.bf16.msra.mxu0 %v1662_v16 }
 0x1fa   : > { %1605 = vmatprep.subr.bf16.mxu0 %v1772_v1 }
 0x1fb   : > { %871 = vbcast.lane.b32.xlu1 %v864_v55, 266  ;;  %867 = vbcast.lane.b32.xlu0 %v864_v55, 258 }
 0x1fd   : > { %1606 = vmatpush3.bf16.msra.mxu0 %v1663_v17 }
 0x1ff   : > { %883 = vbcast.lane.b32.xlu1 %v876_v57, 266  ;;  %879 = vbcast.lane.b32.xlu0 %v876_v57, 258 }
 0x203   : > { %895 = vbcast.lane.b32.xlu1 %v888_v59, 266  ;;  %891 = vbcast.lane.b32.xlu0 %v888_v59, 258 }
 0x207   : > { %907 = vbcast.lane.b32.xlu1 %v900_v61, 266  ;;  %903 = vbcast.lane.b32.xlu0 %v900_v61, 258 }
 0x20b   : > { %919 = vbcast.lane.b32.xlu1 %v912_v0, 266  ;;  %915 = vbcast.lane.b32.xlu0 %v912_v0, 258 }
 0x20f   : > { %1117 = vbcast.lane.b32.xlu1 %v840_v49, 282  ;;  %1113 = vbcast.lane.b32.xlu0 %v840_v49, 274 }
 0x213   : > { %1125 = vbcast.lane.b32.xlu1 %v852_v54, 282  ;;  %1121 = vbcast.lane.b32.xlu0 %v852_v54, 274 }
 0x217   : > { %1109 = vbcast.lane.b32.xlu1 %v828_v50, 282  ;;  %1105 = vbcast.lane.b32.xlu0 %v828_v50, 274 }
 0x21b   : > { %1133 = vbcast.lane.b32.xlu1 %v864_v55, 282  ;;  %1129 = vbcast.lane.b32.xlu0 %v864_v55, 274 }
 0x21f   : > { %1141 = vbcast.lane.b32.xlu1 %v876_v57, 282  ;;  %1137 = vbcast.lane.b32.xlu0 %v876_v57, 274 }
 0x223   : > { %1149 = vbcast.lane.b32.xlu1 %v888_v59, 282  ;;  %1145 = vbcast.lane.b32.xlu0 %v888_v59, 274  ;;  %v618_v59 = vld [vmem:[%s2239_s7] sm:$0xff] }
 0x227   : > { %1157 = vbcast.lane.b32.xlu1 %v900_v61, 282  ;;  %1153 = vbcast.lane.b32.xlu0 %v900_v61, 274 }
 0x22b   : > { %1165 = vbcast.lane.b32.xlu1 %v912_v0, 282  ;;  %1161 = vbcast.lane.b32.xlu0 %v912_v0, 274 }
 0x22f   : > { %1306 = vrot.lane.b32.xlu1 %v1296_v6, %s1774_s26  ;;  %1304 = vrot.lane.b32.xlu0 %v1295_v7, %s1774_s26 }
 0x233   : > { %1308 = vrot.lane.b32.xlu1 %v1297_v8, %s1774_s26  ;;  %1302 = vrot.lane.b32.xlu0 %v1293_v5, %s1774_s26  ;;  %v619_v5 = vld [vmem:[%s2239_s7 + $0x8] sm:$0xff] }
 0x237   : > { %1312 = vrot.lane.b32.xlu1 %v1299_v9, %s1774_s26  ;;  %1310 = vrot.lane.b32.xlu0 %v1298_v11, %s1774_s26 }
 0x23b   : > { %1316 = vrot.lane.b32.xlu1 %v1301_v12, %s1774_s26  ;;  %1314 = vrot.lane.b32.xlu0 %v1300_v13, %s1774_s26 }
 0x261   : > { %v1981_v27 = vpop.permute.xlu0 %831  ;;  %v1983_v28 = vpop.permute.xlu1 %843 }
 0x265   : > { %v1985_v29 = vpop.permute.xlu0 %835  ;;  %v1987_v30 = vpop.permute.xlu1 %847 }
 0x269   : > { %v1989_v32 = vpop.permute.xlu0 %855  ;;  %v1991_v33 = vpop.permute.xlu1 %859 }
 0x26d   : > { %v1993_v37 = vpop.permute.xlu0 %867  ;;  %v1995_v41 = vpop.permute.xlu1 %871 }
 0x271   : > { %v2000_v47 = vpop.permute.xlu0 %879  ;;  %v2002_v50 = vpop.permute.xlu1 %883 }
 0x275   : > { %v2008_v57 = vpop.permute.xlu0 %891  ;;  %v2022_v4 = vpop.permute.xlu1 %895 }
 0x279   : > { %v2039_v39 = vpop.permute.xlu1 %907 }
 0x2c3   : > { %v598_v20 = vpop.f32.mrb[0].mxu0 }
 0x2c4   : > { %v599_v21 = vadd.f32 %v1545_v18, %v598_v20  ;;  %v1597_v22 = vpop.f32.mrb[1].mxu0  ;;  %v2036_v20 = vpop.permute.xlu0 %903 }
 0x2c5   : > { %v601_v23 = vpop.f32.mrb[2].mxu0 }
 0x2c6   : > { %v605_v24 = vmin.f32 %v599_v21, 20.0  ;;  %v1598_v25 = vpop.f32.mrb[3].mxu0  ;;  %vm604_vm9 = vcmp.gt.f32.partialorder %v599_v21, 20.0 }
 0x2c8   : > { %v606_v26 = vmul.f32 1.442695, %v605_v24 }
 0x2ca   : > { %1672 = vpow2.f32 %v606_v26 }
 0x2d4   : > { %v1673_v1 = vpop.eup %1672 }
 0x2d5   : > { %v608_v31 = vadd.f32 1.0, %v1673_v1  ;;  %v611_v34 = vmul.f32 -0.5, %v1673_v1  ;;  %v614_v40 = vand.u32 2147483647, %v1673_v1 }
 0x2d7   : > { %1674 = vlog2.f32 %v608_v31  ;;  %v612_v38 = vadd.f32 1.0, %v611_v34  ;;  %vm615_vm8 = vcmp.lt.f32.partialorder %v614_v40, 0.0004427343 }
 0x2d9   : > { %v613_v45 = vmul.f32 %v1673_v1, %v612_v38 }
 0x2e1   : > { %v1675_v42 = vpop.eup %1674 }
 0x2e2   : > { %v610_v44 = vmul.f32 0.6931472, %v1675_v42 }
 0x2e4   : > { %v616_v48 = vsel %vm615_vm8, %v613_v45, %v610_v44 }
 0x2e5   : > { %v617_v49 = vsel %vm604_vm9, %v599_v21, %v616_v48 }
 0x2e6   : > { %v621_v51 = vcombine.high %v617_v49, %v617_v49  ;;  %v628_v52 = vrot.slane %v617_v49, %v1998_v46  ;;  %v774_v53 = vmul.f32 %v617_v49, %v1943_v43 }
 0x2e8   : > { %v635_v54 = vrot.slane %v621_v51, %v1998_v46  ;;  %v636_v55 = vcombine.high %v628_v52, %v628_v52  ;;  %v644_v56 = vrot.slane %v628_v52, %v1998_v46  ;;  %v776_v10 = vcombine.high %v774_v53, %v774_v53 }
 0x2e9   : > { %v2011_v58 = vrot.slane %v774_v53, %v1998_v46 }
 0x2ea   : > { %v637_v60 = vcombine.high %v635_v54, %v635_v54  ;;  %v651_v61 = vrot.slane %v635_v54, %v1998_v46  ;;  %v658_v62 = vrot.slane %v636_v55, %v1998_v46  ;;  %v666_v63 = vcombine.high %v644_v56, %v644_v56 }
 0x2eb   : > { %v673_v0 = vrot.slane %v644_v56, %v1935_v19  ;;  %v790_v2 = vrot.slane %v776_v10, %v1998_v46  ;;  %v791_v3 = vcombine.high %v2011_v58, %v2011_v58  ;;  %v799_v14 = vrot.slane %v2011_v58, %v1998_v46  ;;  %v2041_v56 = vpop.permute.xlu0 %915 }
 0x2ec   : > { %v665_v6 = vrot.slane %v637_v60, %v1998_v46  ;;  %v667_v7 = vcombine.high %v651_v61, %v651_v61  ;;  %v668_v8 = vcombine.high %v658_v62, %v658_v62  ;;  %v677_v9 = vrot.slane %v658_v62, %v1935_v19 }
 0x2ed   : > { %v681_v11 = vrot.slane %v666_v63, %v1935_v19  ;;  %v689_v12 = vrot.slane %v651_v61, %v1935_v19  ;;  %v710_v13 = vmul.f32 %v673_v0, %v618_v59  ;;  %v711_v21 = vmul.f32 %v673_v0, %v619_v5 }
 0x2ee   : > { %v669_v15 = vcombine.high %v665_v6, %v665_v6  ;;  %v685_v16 = vrot.slane %v668_v8, %v1935_v19  ;;  %v693_v17 = vrot.slane %v665_v6, %v1935_v19  ;;  %v697_v18 = vrot.slane %v667_v7, %v1935_v19  ;;  %v2043_v6 = vpop.permute.xlu1 %919 }
 0x2ef   : > { %v712_v22 = vmul.f32 %v677_v9, %v618_v59  ;;  %v713_v23 = vmul.f32 %v677_v9, %v619_v5  ;;  %v714_v24 = vmul.f32 %v681_v11, %v618_v59  ;;  %v715_v26 = vmul.f32 %v681_v11, %v619_v5 }
 0x2f0   : > { %v701_v25 = vrot.slane %v669_v15, %v1935_v19  ;;  %v716_v1 = vmul.f32 %v685_v16, %v618_v59  ;;  %v717_v31 = vmul.f32 %v685_v16, %v619_v5  ;;  %v718_v34 = vmul.f32 %v689_v12, %v618_v59 }
 0x2f1   : > { %v719_v35 = vmul.f32 %v689_v12, %v619_v5  ;;  %v720_v36 = vmul.f32 %v693_v17, %v618_v59  ;;  %v721_v38 = vmul.f32 %v693_v17, %v619_v5  ;;  %v722_v40 = vmul.f32 %v697_v18, %v618_v59 }
 0x2f2   : > { %v723_v42 = vmul.f32 %v697_v18, %v619_v5  ;;  %v724_v44 = vmul.f32 %v701_v25, %v618_v59  ;;  %v726_v45 = vmul.f32 1.442695, %v710_v13  ;;  %v725_v48 = vmul.f32 %v701_v25, %v619_v5  ;;  %v2049_v18 = vpop.permute.xlu0 %1113 }
 0x2f3   : > { %v728_v49 = vmul.f32 1.442695, %v711_v21  ;;  %v730_v51 = vmul.f32 1.442695, %v712_v22  ;;  %v732_v52 = vmul.f32 1.442695, %v713_v23  ;;  %v792_v55 = vcombine.high %v790_v2, %v790_v2 }
 0x2f4   : > { %1676 = vpow2.f32 %v726_v45  ;;  %v734_v53 = vmul.f32 1.442695, %v714_v24  ;;  %v736_v54 = vmul.f32 1.442695, %v715_v26  ;;  %v738_v10 = vmul.f32 1.442695, %v716_v1  ;;  %v2060_v1 = vpop.permute.xlu1 %1117 }
 0x2f5   : > { %1678 = vpow2.f32 %v728_v49  ;;  %v740_v58 = vmul.f32 1.442695, %v717_v31  ;;  %v742_v60 = vmul.f32 1.442695, %v718_v34  ;;  %v744_v61 = vmul.f32 1.442695, %v719_v35 }
 0x2f6   : > { %1680 = vpow2.f32 %v730_v51  ;;  %v746_v62 = vmul.f32 1.442695, %v720_v36  ;;  %v748_v63 = vmul.f32 1.442695, %v721_v38  ;;  %v750_v59 = vmul.f32 1.442695, %v722_v40 }
 0x2f7   : > { %1682 = vpow2.f32 %v732_v52  ;;  %v752_v0 = vmul.f32 1.442695, %v723_v42  ;;  %v754_v5 = vmul.f32 1.442695, %v724_v44  ;;  %v806_v7 = vrot.slane %v790_v2, %v1998_v46 }
 0x2f8   : > { %1684 = vpow2.f32 %v734_v53  ;;  %v813_v8 = vrot.slane %v791_v3, %v1998_v46  ;;  %v820_v9 = vrot.slane %v792_v55, %v1998_v46  ;;  %v756_v11 = vmul.f32 1.442695, %v725_v48 }
 0x2f9   : > { %1686 = vpow2.f32 %v736_v54  ;;  %v821_v12 = vcombine.high %v799_v14, %v799_v14  ;;  %v924_v13 = vrot.slane %v799_v14, %v1935_v19  ;;  %v822_v15 = vcombine.high %v806_v7, %v806_v7 }
 0x2fa   : > { %1688 = vpow2.f32 %v738_v10  ;;  %v823_v16 = vcombine.high %v813_v8, %v813_v8  ;;  %v824_v17 = vcombine.high %v820_v9, %v820_v9  ;;  %v928_v21 = vrot.slane %v813_v8, %v1935_v19 }
 0x2fb   : > { %1690 = vpow2.f32 %v740_v58  ;;  %v932_v2 = vrot.slane %v821_v12, %v1935_v19  ;;  %v940_v3 = vrot.slane %v806_v7, %v1935_v19  ;;  %v944_v22 = vrot.slane %v820_v9, %v1935_v19 }
 0x2fc   : > { %1692 = vpow2.f32 %v742_v60  ;;  %v936_v46 = vrot.slane %v823_v16, %v1935_v19  ;;  %v948_v14 = vrot.slane %v822_v15, %v1935_v19  ;;  %v952_v23 = vrot.slane %v824_v17, %v1935_v19 }
 0x2fd   : > { %1694 = vpow2.f32 %v744_v61  ;;  %v961_v24 = vmul.f32 %v924_v13, %v1981_v27  ;;  %v962_v25 = vmul.f32 %v924_v13, %v1985_v29  ;;  %v963_v31 = vmul.f32 %v928_v21, %v1983_v28 }
 0x2fe   : > { %v1677_v26 = vpop.eup %1676  ;;  %1696 = vpow2.f32 %v746_v62  ;;  %v964_v34 = vmul.f32 %v928_v21, %v1987_v30  ;;  %v965_v35 = vmul.f32 %v932_v2, %v1989_v32  ;;  %v966_v19 = vmul.f32 %v932_v2, %v1991_v33 }
 0x2ff   : > { %v1679_v36 = vpop.eup %1678  ;;  %1698 = vpow2.f32 %v748_v63  ;;  %758 = vst.msk [vmem:[#allocation2] sm:$0xff] %vm503_vm5, %v1677_v26  ;;  %v967_v27 = vmul.f32 %v936_v46, %v1993_v37  ;;  %v968_v29 = vmul.f32 %v936_v46, %v1995_v41  ;;  %977 = vst.msk [vmem:[#allocation3] sm:$0xff] %vm503_vm5, %v961_v24  ;;  %v969_v28 = vmul.f32 %v940_v3, %v2000_v47  ;;  %v2078_v37 = vpop.permute.xlu0 %1121 }
 0x300   : > { %978 = vst.msk [vmem:[#allocation3 + $0x8] sm:$0xff] %vm503_vm5, %v962_v25  ;;  %v1681_v38 = vpop.eup %1680  ;;  %1700 = vpow2.f32 %v750_v59  ;;  %759 = vst.msk [vmem:[#allocation2 + $0x8] sm:$0xff] %vm503_vm5, %v1679_v36  ;;  %v970_v30 = vmul.f32 %v940_v3, %v2002_v50  ;;  %v971_v32 = vmul.f32 %v944_v22, %v2008_v57  ;;  %v972_v41 = vmul.f32 %v944_v22, %v2022_v4 }
 0x301   : > { %979 = vst.msk [vmem:[#allocation3 + $0x10] sm:$0xff] %vm503_vm5, %v963_v31  ;;  %980 = vst.msk [vmem:[#allocation3 + $0x18] sm:$0xff] %vm503_vm5, %v964_v34  ;;  %v1683_v33 = vpop.eup %1682  ;;  %1702 = vpow2.f32 %v752_v0  ;;  %v973_v47 = vmul.f32 %v948_v14, %v2036_v20  ;;  %v974_v50 = vmul.f32 %v948_v14, %v2039_v39  ;;  %v975_v40 = vmul.f32 %v952_v23, %v2041_v56  ;;  %v2097_v39 = vpop.permute.xlu1 %1125 }
 0x302   : > { %981 = vst.msk [vmem:[#allocation3 + $0x20] sm:$0xff] %vm503_vm5, %v965_v35  ;;  %760 = vst.msk [vmem:[#allocation2 + $0x10] sm:$0xff] %vm503_vm5, %v1681_v38  ;;  %v1685_v57 = vpop.eup %1684  ;;  %1704 = vpow2.f32 %v754_v5  ;;  %v976_v42 = vmul.f32 %v952_v23, %v2043_v6 }
 0x303   : > { %982 = vst.msk [vmem:[#allocation3 + $0x28] sm:$0xff] %vm503_vm5, %v966_v19  ;;  %983 = vst.msk [vmem:[#allocation3 + $0x30] sm:$0xff] %vm503_vm5, %v967_v27  ;;  %v1687_v4 = vpop.eup %1686  ;;  %1706 = vpow2.f32 %v756_v11  ;;  %v1106_v51 = vpop.permute.xlu0 %1105 }
 0x304   : > { %984 = vst.msk [vmem:[#allocation3 + $0x38] sm:$0xff] %vm503_vm5, %v968_v29  ;;  %761 = vst.msk [vmem:[#allocation2 + $0x18] sm:$0xff] %vm503_vm5, %v1683_v33  ;;  %v1689_v20 = vpop.eup %1688 }
 0x305   : > { %985 = vst.msk [vmem:[#allocation3 + $0x40] sm:$0xff] %vm503_vm5, %v969_v28  ;;  %986 = vst.msk [vmem:[#allocation3 + $0x48] sm:$0xff] %vm503_vm5, %v970_v30  ;;  %v1691_v44 = vpop.eup %1690  ;;  %v1110_v62 = vpop.permute.xlu1 %1109 }
 0x306   : > { %987 = vst.msk [vmem:[#allocation3 + $0x50] sm:$0xff] %vm503_vm5, %v971_v32  ;;  %762 = vst.msk [vmem:[#allocation2 + $0x20] sm:$0xff] %vm503_vm5, %v1685_v57  ;;  %v1693_v45 = vpop.eup %1692  ;;  %v993_v48 = vld [vmem:[#allocation2] sm:$0xff] }
 0x307   : > { %988 = vst.msk [vmem:[#allocation3 + $0x58] sm:$0xff] %vm503_vm5, %v972_v41  ;;  %989 = vst.msk [vmem:[#allocation3 + $0x60] sm:$0xff] %vm503_vm5, %v973_v47  ;;  %v1695_v49 = vpop.eup %1694  ;;  %v994_v52 = vld [vmem:[#allocation2 + $0x8] sm:$0xff]  ;;  %v995_v53 = vmul.f32 0.0, %v993_v48  ;;  %v997_v56 = vld [vmem:[#allocation3] sm:$0xff]  ;;  %v2112_v12 = vpop.permute.xlu0 %1129 }
 0x308   : > { %990 = vst.msk [vmem:[#allocation3 + $0x68] sm:$0xff] %vm503_vm5, %v974_v50  ;;  %763 = vst.msk [vmem:[#allocation2 + $0x28] sm:$0xff] %vm503_vm5, %v1687_v4  ;;  %v1697_v54 = vpop.eup %1696  ;;  %v996_v55 = vmul.f32 0.0, %v994_v52  ;;  %v998_v58 = vld [vmem:[#allocation3 + $0x8] sm:$0xff]  ;;  %v1009_v9 = vld [vmem:[#allocation3 + $0x10] sm:$0xff] }
 0x309   : > { %991 = vst.msk [vmem:[#allocation3 + $0x70] sm:$0xff] %vm503_vm5, %v975_v40  ;;  %992 = vst.msk [vmem:[#allocation3 + $0x78] sm:$0xff] %vm503_vm5, %v976_v42  ;;  %v1699_v10 = vpop.eup %1698  ;;  %v999_v60 = vadd.f32 %v997_v56, %v995_v53  ;;  %v1004_v59 = vld [vmem:[#allocation2 + $0x10] sm:$0xff]  ;;  %v1010_v13 = vld [vmem:[#allocation3 + $0x18] sm:$0xff]  ;;  %v2117_v3 = vpop.permute.xlu1 %1133 }
 0x30a   : > { %764 = vst.msk [vmem:[#allocation2 + $0x30] sm:$0xff] %vm503_vm5, %v1689_v20  ;;  %765 = vst.msk [vmem:[#allocation2 + $0x38] sm:$0xff] %vm503_vm5, %v1691_v44  ;;  %v1701_v61 = vpop.eup %1700  ;;  %v1000_v63 = vadd.f32 %v998_v58, %v996_v55  ;;  %v1021_v22 = vld [vmem:[#allocation3 + $0x20] sm:$0xff]  ;;  %v1022_v14 = vld [vmem:[#allocation3 + $0x28] sm:$0xff] }
 0x30b   : > { %766 = vst.msk [vmem:[#allocation2 + $0x40] sm:$0xff] %vm503_vm5, %v1693_v45  ;;  %767 = vst.msk [vmem:[#allocation2 + $0x48] sm:$0xff] %vm503_vm5, %v1695_v49  ;;  %v1703_v0 = vpop.eup %1702  ;;  %v1005_v5 = vld [vmem:[#allocation2 + $0x18] sm:$0xff]  ;;  %v1006_v6 = vmul.f32 %v1004_v59, %v999_v60  ;;  %v2120_v31 = vpop.permute.xlu0 %1137  ;;  %v1033_v29 = vld [vmem:[#allocation3 + $0x30] sm:$0xff] }
 0x30c   : > { %768 = vst.msk [vmem:[#allocation2 + $0x50] sm:$0xff] %vm503_vm5, %v1697_v54  ;;  %769 = vst.msk [vmem:[#allocation2 + $0x58] sm:$0xff] %vm503_vm5, %v1699_v10  ;;  %v1705_v7 = vpop.eup %1704  ;;  %v1007_v8 = vmul.f32 %v1005_v5, %v1000_v63  ;;  %v1034_v28 = vld [vmem:[#allocation3 + $0x38] sm:$0xff]  ;;  %v1045_v45 = vld [vmem:[#allocation3 + $0x40] sm:$0xff] }
 0x30d   : > { %770 = vst.msk [vmem:[#allocation2 + $0x60] sm:$0xff] %vm503_vm5, %v1701_v61  ;;  %1001 = vst.msk [vmem:[#allocation3] sm:$0xff] %vm503_vm5, %v999_v60  ;;  %v1707_v11 = vpop.eup %1706  ;;  %v1011_v15 = vadd.f32 %v1009_v9, %v1006_v6  ;;  %v1016_v17 = vld [vmem:[#allocation2 + $0x20] sm:$0xff]  ;;  %v2124_v32 = vpop.permute.xlu1 %1141 }
 0x30e   : > { %771 = vst.msk [vmem:[#allocation2 + $0x68] sm:$0xff] %vm503_vm5, %v1703_v0  ;;  %1002 = vst.msk [vmem:[#allocation3 + $0x8] sm:$0xff] %vm503_vm5, %v1000_v63  ;;  %v1012_v16 = vadd.f32 %v1010_v13, %v1007_v8  ;;  %v1057_v0 = vld [vmem:[#allocation3 + $0x50] sm:$0xff]  ;;  %v1058_v6 = vld [vmem:[#allocation3 + $0x58] sm:$0xff] }
 0x30f   : > { %772 = vst.msk [vmem:[#allocation2 + $0x70] sm:$0xff] %vm503_vm5, %v1705_v7  ;;  %773 = vst.msk [vmem:[#allocation2 + $0x78] sm:$0xff] %vm503_vm5, %v1707_v11  ;;  %v1017_v21 = vld [vmem:[#allocation2 + $0x28] sm:$0xff]  ;;  %v1018_v2 = vmul.f32 %v1016_v17, %v1011_v15  ;;  %v2132_v49 = vpop.permute.xlu0 %1145 }
 0x310   : > { %1013 = vst.msk [vmem:[#allocation3 + $0x10] sm:$0xff] %vm503_vm5, %v1011_v15  ;;  %1014 = vst.msk [vmem:[#allocation3 + $0x18] sm:$0xff] %vm503_vm5, %v1012_v16  ;;  %v1019_v46 = vmul.f32 %v1017_v21, %v1012_v16 }
 0x311   : > { %v1023_v23 = vadd.f32 %v1021_v22, %v1018_v2  ;;  %v1028_v25 = vld [vmem:[#allocation2 + $0x30] sm:$0xff]  ;;  %v1029_v34 = vld [vmem:[#allocation2 + $0x38] sm:$0xff]  ;;  %v2138_v63 = vpop.permute.xlu1 %1149 }
 0x312   : > { %v1024_v24 = vadd.f32 %v1022_v14, %v1019_v46  ;;  %v1040_v41 = vld [vmem:[#allocation2 + $0x40] sm:$0xff]  ;;  %v1041_v40 = vld [vmem:[#allocation2 + $0x48] sm:$0xff] }
 0x313   : > { %1025 = vst.msk [vmem:[#allocation3 + $0x20] sm:$0xff] %vm503_vm5, %v1023_v23  ;;  %v1030_v35 = vmul.f32 %v1028_v25, %v1023_v23  ;;  %v1052_v56 = vld [vmem:[#allocation2 + $0x50] sm:$0xff]  ;;  %v2144_v17 = vpop.permute.xlu0 %1153  ;;  %v1069_v23 = vld [vmem:[#allocation3 + $0x60] sm:$0xff] }
 0x314   : > { %v1087_v26 = vld [vmem:[#allocation3] sm:$0xff]  ;;  %1026 = vst.msk [vmem:[#allocation3 + $0x28] sm:$0xff] %vm503_vm5, %v1024_v24  ;;  %v1031_v27 = vmul.f32 %v1029_v34, %v1024_v24 }
 0x315   : > { %v1088_v36 = vld [vmem:[#allocation3 + $0x8] sm:$0xff]  ;;  %v1167_v19 = vmul.f32 %v1106_v51, %v1087_v26  ;;  %v1035_v30 = vadd.f32 %v1033_v29, %v1030_v35  ;;  %v1064_v15 = vld [vmem:[#allocation2 + $0x60] sm:$0xff] }
 0x316   : > { %v1168_v38 = vmul.f32 %v1110_v62, %v1088_v36  ;;  %v1036_v33 = vadd.f32 %v1034_v28, %v1031_v27  ;;  %v1046_v51 = vld [vmem:[#allocation3 + $0x48] sm:$0xff]  ;;  %v1158_v27 = vpop.permute.xlu1 %1157 }
 0x317   : > { %v1089_v47 = vld [vmem:[#allocation3 + $0x10] sm:$0xff]  ;;  %v1183_v50 = vsel %vm503_vm5, %v1167_v19, 0.0  ;;  %1037 = vst.msk [vmem:[#allocation3 + $0x30] sm:$0xff] %vm503_vm5, %v1035_v30  ;;  %v1042_v42 = vmul.f32 %v1040_v41, %v1035_v30  ;;  %v1090_v4 = vld [vmem:[#allocation3 + $0x18] sm:$0xff]  ;;  %v1065_v21 = vld [vmem:[#allocation2 + $0x68] sm:$0xff] }
 0x318   : > { %v1184_v57 = vsel %vm503_vm5, %v1168_v38, 0.0  ;;  %v1169_v20 = vmul.f32 %v2049_v18, %v1089_v47  ;;  %1038 = vst.msk [vmem:[#allocation3 + $0x38] sm:$0xff] %vm503_vm5, %v1036_v33  ;;  %v1043_v44 = vmul.f32 %v1041_v40, %v1036_v33  ;;  %v1170_v48 = vmul.f32 %v2060_v1, %v1090_v4  ;;  %v1053_v18 = vld [vmem:[#allocation2 + $0x58] sm:$0xff]  ;;  %v1070_v26 = vld [vmem:[#allocation3 + $0x68] sm:$0xff]  ;;  %v1076_v38 = vld [vmem:[#allocation2 + $0x70] sm:$0xff] }
 0x319   : > { %v1047_v52 = vadd.f32 %v1045_v45, %v1042_v42  ;;  %v1185_v53 = vadd.f32 %v1184_v57, %v1183_v50  ;;  %v1077_v33 = vld [vmem:[#allocation2 + $0x78] sm:$0xff]  ;;  %v1547_v57 = vld [vmem:[%s2240_s8] ss:$0 sm:$0xff]  ;;  %v1081_v42 = vld [vmem:[#allocation3 + $0x70] sm:$0xff]  ;;  %v1162_v45 = vpop.permute.xlu0 %1161 }
 0x31a   : > { %v1192_v54 = vsel %vm503_vm5, %v1169_v20, 0.0  ;;  %v1048_v55 = vadd.f32 %v1046_v51, %v1043_v44  ;;  %v1091_v10 = vld [vmem:[#allocation3 + $0x20] sm:$0xff]  ;;  %v1193_v58 = vsel %vm503_vm5, %v1170_v48, 0.0  ;;  %v1082_v48 = vld [vmem:[#allocation3 + $0x78] sm:$0xff] }
 0x31b   : > { %1049 = vst.msk [vmem:[#allocation3 + $0x40] sm:$0xff] %vm503_vm5, %v1047_v52  ;;  %v1054_v60 = vmul.f32 %v1052_v56, %v1047_v52  ;;  %v1092_v61 = vld [vmem:[#allocation3 + $0x28] sm:$0xff]  ;;  %v1171_v62 = vmul.f32 %v2078_v37, %v1091_v10  ;;  %v1194_v1 = vadd.f32 %v1193_v58, %v1192_v54  ;;  %v1186_v8 = vrot.slane %v1185_v53, 4 }
 0x31c   : > { %1050 = vst.msk [vmem:[#allocation3 + $0x48] sm:$0xff] %vm503_vm5, %v1048_v55  ;;  %v1055_v59 = vmul.f32 %v1053_v18, %v1048_v55  ;;  %v1172_v5 = vmul.f32 %v2097_v39, %v1092_v61  ;;  %v2162_v58 = vmul.f32 %v1547_v57, %v1943_v43  ;;  %v1166_v61 = vpop.permute.xlu1 %1165 }
 0x31d   : > { %v1059_v7 = vadd.f32 %v1057_v0, %v1054_v60  ;;  %v1195_v9 = vrot.slane %v1194_v1, 4  ;;  %v1201_v11 = vsel %vm503_vm5, %v1171_v62, 0.0  ;;  %v1187_v35 = vadd.f32 %v1186_v8, %v1185_v53 }
 0x31e   : > { %v1060_v13 = vadd.f32 %v1058_v6, %v1055_v59  ;;  %v1093_v16 = vld [vmem:[#allocation3 + $0x30] sm:$0xff]  ;;  %v1202_v37 = vsel %vm503_vm5, %v1172_v5, 0.0 }
 0x31f   : > { %1061 = vst.msk [vmem:[#allocation3 + $0x50] sm:$0xff] %vm503_vm5, %v1059_v7  ;;  %v1066_v2 = vmul.f32 %v1064_v15, %v1059_v7  ;;  %v1094_v46 = vld [vmem:[#allocation3 + $0x38] sm:$0xff]  ;;  %v1173_v39 = vmul.f32 %v2112_v12, %v1093_v16  ;;  %v1196_v22 = vadd.f32 %v1195_v9, %v1194_v1  ;;  %v1203_v25 = vadd.f32 %v1202_v37, %v1201_v11 }
 0x320   : > { %1062 = vst.msk [vmem:[#allocation3 + $0x58] sm:$0xff] %vm503_vm5, %v1060_v13  ;;  %v1067_v14 = vmul.f32 %v1065_v21, %v1060_v13  ;;  %v1174_v24 = vmul.f32 %v2117_v3, %v1094_v46  ;;  %v1188_v52 = vrot.slane %v1187_v35, 2  ;;  %v1305_v13 = vpop.permute.xlu0 %1304 }
 0x321   : > { %v1071_v34 = vadd.f32 %v1069_v23, %v1066_v2  ;;  %v1197_v36 = vrot.slane %v1196_v22, 2  ;;  %v1210_v19 = vsel %vm503_vm5, %v1173_v39, 0.0  ;;  %v1204_v30 = vrot.slane %v1203_v25, 4 }
 0x322   : > { %v1072_v29 = vadd.f32 %v1070_v26, %v1067_v14  ;;  %v1095_v28 = vld [vmem:[#allocation3 + $0x40] sm:$0xff]  ;;  %v1211_v12 = vsel %vm503_vm5, %v1174_v24, 0.0  ;;  %v1189_v43 = vadd.f32 %v1188_v52, %v1187_v35  ;;  %v1265_v39 = vrot.slane %v2162_v58, 2 }
 0x323   : > { %1073 = vst.msk [vmem:[#allocation3 + $0x60] sm:$0xff] %vm503_vm5, %v1071_v34  ;;  %v1078_v41 = vmul.f32 %v1076_v38, %v1071_v34  ;;  %v1096_v47 = vld [vmem:[#allocation3 + $0x48] sm:$0xff]  ;;  %v1175_v3 = vmul.f32 %v2120_v31, %v1095_v28  ;;  %v1198_v50 = vadd.f32 %v1197_v36, %v1196_v22  ;;  %v1205_v20 = vadd.f32 %v1204_v30, %v1203_v25  ;;  %v1307_v25 = vpop.permute.xlu1 %1306 }
 0x324   : > { %1074 = vst.msk [vmem:[#allocation3 + $0x68] sm:$0xff] %vm503_vm5, %v1072_v29  ;;  %v1079_v40 = vmul.f32 %v1077_v33, %v1072_v29  ;;  %v1176_v4 = vmul.f32 %v2124_v32, %v1096_v47  ;;  %v1212_v44 = vadd.f32 %v1211_v12, %v1210_v19  ;;  %v1266_v24 = vrot.slane %v2162_v58, 3  ;;  %v1303_v47 = vpop.permute.xlu0 %1302 }
 0x325   : > { %v1083_v51 = vadd.f32 %v1081_v42, %v1078_v41  ;;  %v1219_v53 = vsel %vm503_vm5, %v1175_v3, 0.0  ;;  %v1206_v55 = vrot.slane %v1205_v20, 2  ;;  %v1199_v1 = vrot.slane %v1198_v50, 1 }
 0x326   : > { %v1084_v31 = vadd.f32 %v1082_v48, %v1079_v40  ;;  %v1097_v54 = vld [vmem:[#allocation3 + $0x50] sm:$0xff]  ;;  %v1213_v56 = vrot.slane %v1212_v44, 4  ;;  %v1220_v10 = vsel %vm503_vm5, %v1176_v4, 0.0  ;;  %v1190_v34 = vrot.slane %v1189_v43, 1 }
 0x327   : > { %1085 = vst.msk [vmem:[#allocation3 + $0x70] sm:$0xff] %vm503_vm5, %v1083_v51  ;;  %v1098_v32 = vld [vmem:[#allocation3 + $0x58] sm:$0xff]  ;;  %v1177_v18 = vmul.f32 %v2132_v49, %v1097_v54  ;;  %v1221_v60 = vadd.f32 %v1220_v10, %v1219_v53  ;;  %v1207_v59 = vadd.f32 %v1206_v55, %v1205_v20  ;;  %v1200_v2 = vadd.f32 %v1199_v1, %v1198_v50  ;;  %v1309_v53 = vpop.permute.xlu1 %1308 }
 0x328   : > { %1086 = vst.msk [vmem:[#allocation3 + $0x78] sm:$0xff] %vm503_vm5, %v1084_v31  ;;  %v1178_v62 = vmul.f32 %v2138_v63, %v1098_v32  ;;  %v1214_v0 = vadd.f32 %v1213_v56, %v1212_v44  ;;  %v1264_v63 = vrot.slane %v2162_v58, 1  ;;  %v1267_v33 = vrot.slane %v2162_v58, 4 }
 0x329   : > { %v1222_v5 = vrot.slane %v1221_v60, 4  ;;  %v1228_v6 = vsel %vm503_vm5, %v1177_v18, 0.0  ;;  %v1208_v8 = vrot.slane %v1207_v59, 1  ;;  %v1191_v42 = vadd.f32 %v1190_v34, %v1189_v43 }
 0x32a   : > { %v1099_v7 = vld [vmem:[#allocation3 + $0x60] sm:$0xff]  ;;  %v1215_v9 = vrot.slane %v1214_v0, 2  ;;  %v1229_v11 = vsel %vm503_vm5, %v1178_v62, 0.0  ;;  %v1280_v41 = vadd.f32 %v1264_v63, %v1200_v2  ;;  %v1268_v32 = vrot.slane %v2162_v58, 5 }
 0x32b   : > { %v1100_v49 = vld [vmem:[#allocation3 + $0x68] sm:$0xff]  ;;  %v1179_v15 = vmul.f32 %v2144_v17, %v1099_v7  ;;  %v1223_v16 = vadd.f32 %v1222_v5, %v1221_v60  ;;  %v1230_v37 = vadd.f32 %v1229_v11, %v1228_v6  ;;  %v1209_v35 = vadd.f32 %v1208_v8, %v1207_v59 }
 0x32c   : > { %v1180_v21 = vmul.f32 %v1158_v27, %v1100_v49  ;;  %v1216_v46 = vadd.f32 %v1215_v9, %v1214_v0  ;;  %v1327_v31 = vmul.f32 %v1305_v13, %v1280_v41  ;;  %v1279_v18 = vadd.f32 %v2162_v58, %v1191_v42  ;;  %v1313_v9 = vpop.permute.xlu1 %1312 }
 0x32d   : > { %v1224_v22 = vrot.slane %v1223_v16, 2  ;;  %v1231_v14 = vrot.slane %v1230_v37, 4  ;;  %v1237_v23 = vsel %vm503_vm5, %v1179_v15, 0.0  ;;  %v1281_v20 = vadd.f32 %v1265_v39, %v1209_v35 }
 0x32e   : > { %v1101_v26 = vld [vmem:[#allocation3 + $0x70] sm:$0xff]  ;;  %v1217_v17 = vrot.slane %v1216_v46, 1  ;;  %v1238_v36 = vsel %vm503_vm5, %v1180_v21, 0.0  ;;  %v1335_v8 = vpack.c.bf16 %v1327_v31, %v1327_v31  ;;  %v1269_v11 = vrot.slane %v2162_v58, 6 }
 0x32f   : > { %v1102_v19 = vld [vmem:[#allocation3 + $0x78] sm:$0xff]  ;;  %v1181_v29 = vmul.f32 %v1162_v45, %v1101_v26  ;;  %v1225_v27 = vadd.f32 %v1224_v22, %v1223_v16  ;;  %v1232_v38 = vadd.f32 %v1231_v14, %v1230_v37  ;;  %v1239_v28 = vadd.f32 %v1238_v36, %v1237_v23 }
 0x330   : > { %v1182_v30 = vmul.f32 %v1166_v61, %v1102_v19  ;;  %v1218_v12 = vadd.f32 %v1217_v17, %v1216_v46  ;;  %v1328_v60 = vmul.f32 %v1307_v25, %v1281_v20  ;;  %v1311_v61 = vpop.permute.xlu0 %1310  ;;  %v1326_v13 = vmul.f32 %v1303_v47, %v1279_v18 }
 0x331   : > { %v1226_v3 = vrot.slane %v1225_v27, 1  ;;  %v1233_v50 = vrot.slane %v1232_v38, 2  ;;  %v1240_v57 = vrot.slane %v1239_v28, 4  ;;  %v1246_v40 = vsel %vm503_vm5, %v1181_v29, 0.0 }
 0x332   : > { %v1247_v4 = vsel %vm503_vm5, %v1182_v30, 0.0  ;;  %v1282_v44 = vadd.f32 %v1266_v24, %v1218_v12  ;;  %v1336_v49 = vpack.c.bf16 %v1328_v60, %v1328_v60  ;;  %v1359_v22 = vunpack.c.l.b16 %v1335_v8 }
 0x333   : > { %v1227_v45 = vadd.f32 %v1226_v3, %v1225_v27  ;;  %v1234_v48 = vadd.f32 %v1233_v50, %v1232_v38  ;;  %v1241_v51 = vadd.f32 %v1240_v57, %v1239_v28  ;;  %v1248_v52 = vadd.f32 %v1247_v4, %v1246_v40  ;;  %v1317_v38 = vpop.permute.xlu1 %1316 }
 0x334   : > { %v1329_v0 = vmul.f32 %v1309_v53, %v1282_v44  ;;  %v1315_v14 = vpop.permute.xlu0 %1314  ;;  %v1270_v23 = vrot.slane %v2162_v58, 7  ;;  %v1360_v24 = vunpack.c.l.b16 %v1336_v49  ;;  %v1334_v34 = vpack.c.bf16 %v1326_v13, %v1326_v13 }
 0x335   : > { %v1235_v54 = vrot.slane %v1234_v48, 1  ;;  %v1242_v55 = vrot.slane %v1241_v51, 2  ;;  %v1249_v56 = vrot.slane %v1248_v52, 4  ;;  %v1283_v10 = vadd.f32 %v1267_v33, %v1227_v45 }
 0x336   : > { %v1337_v63 = vpack.c.bf16 %v1329_v0, %v1329_v0  ;;  %v1366_v27 = vrot.slane %v1359_v22, 7  ;;  %v1369_v28 = vrot.slane %v1360_v24, 6  ;;  %v1358_v12 = vunpack.c.l.b16 %v1334_v34 }
 0x337   : > { %v1236_v62 = vadd.f32 %v1235_v54, %v1234_v48  ;;  %v1243_v1 = vadd.f32 %v1242_v55, %v1241_v51  ;;  %v1250_v59 = vadd.f32 %v1249_v56, %v1248_v52  ;;  %v1330_v5 = vmul.f32 %v1311_v61, %v1283_v10 }
 0x338   : > { %v1361_v35 = vunpack.c.l.b16 %v1337_v63  ;;  %v1368_v3 = vsel %vm1367_vm10, %v1366_v27, %v1358_v12 }
 0x339   : > { %v1244_v6 = vrot.slane %v1243_v1, 1  ;;  %v1251_v7 = vrot.slane %v1250_v59, 2  ;;  %v1284_v43 = vadd.f32 %v1268_v32, %v1236_v62  ;;  %v1338_v21 = vpack.c.bf16 %v1330_v5, %v1330_v5 }
 0x33a   : > { %v1372_v41 = vrot.slane %v1361_v35, 5  ;;  %v1371_v57 = vsel %vm1370_vm11, %v1369_v28, %v1368_v3 }
 0x33b   : > { %v1245_v15 = vadd.f32 %v1244_v6, %v1243_v1  ;;  %v1252_v16 = vadd.f32 %v1251_v7, %v1250_v59  ;;  %v1331_v37 = vmul.f32 %v1313_v9, %v1284_v43  ;;  %v1362_v17 = vunpack.c.l.b16 %v1338_v21 }
 0x33c   : > { %v1374_v4 = vsel %vm1373_vm12, %v1372_v41, %v1371_v57 }
 0x33d   : > { %v1253_v2 = vrot.slane %v1252_v16, 1  ;;  %v1285_v46 = vadd.f32 %v1269_v11, %v1245_v15  ;;  %v1339_v39 = vpack.c.bf16 %v1331_v37, %v1331_v37  ;;  %v1375_v58 = vrot.slane %v1362_v17, 4 }
 0x33f   : > { %v1254_v25 = vadd.f32 %v1253_v2, %v1252_v16  ;;  %v1332_v26 = vmul.f32 %v1315_v14, %v1285_v46  ;;  %v1363_v29 = vunpack.c.l.b16 %v1339_v39  ;;  %v1377_v20 = vsel %vm1376_vm13, %v1375_v58, %v1374_v4 }
 0x341   : > { %v1286_v36 = vadd.f32 %v1270_v23, %v1254_v25  ;;  %v1340_v19 = vpack.c.bf16 %v1332_v26, %v1332_v26  ;;  %v1378_v50 = vrot.slane %v1363_v29, 3 }
 0x343   : > { %v1333_v30 = vmul.f32 %v1317_v38, %v1286_v36  ;;  %v1364_v33 = vunpack.c.l.b16 %v1340_v19  ;;  %v1380_v44 = vsel %vm1379_vm14, %v1378_v50, %v1377_v20 }
 0x345   : > { %v1341_v47 = vpack.c.bf16 %v1333_v30, %v1333_v30  ;;  %v1381_v40 = vrot.slane %v1364_v33, 2 }
 0x347   : > { %v1365_v42 = vunpack.c.l.b16 %v1341_v47  ;;  %v1383_v48 = vsel %vm1382_vm15, %v1381_v40, %v1380_v44 }
 0x349   : > { %v1384_v45 = vrot.slane %v1365_v42, 1 }
 0x34b   : > { %v1386_v51 = vsel %vm1385_vm0, %v1384_v45, %v1383_v48 }
 0x34c   : > { %v1387_v52 = vpack.c.b16 %v1386_v51, %v1386_v51 }
 0x34e   : > { %1608 = vmatmul.mubr.msk.bf16.vlgmr.msra.gmra.mrb[4].mxu0 %vm503_vm5, %v1387_v52 }
 0x421   : > { %v1449_v53 = vpop.f32.mrb[4].mxu0 }
 0x422   : > { %1455 = vst.msk [vmem:[%s350_s21] sm:$0xff] %vm374_vm1, %v1449_v53  ;;  %v1609_v31 = vpop.f32.mrb[5].mxu0 }
 0x423   : > { %v1452_v54 = vpop.f32.mrb[6].mxu0 }
 0x424   : > { %1721 = shalt.err (!%p1718_p3)
}
 0x425   : > { %s1722_s12 = scalar_lea.hbm %s2189_s28, 128  ;;  %s1726_s26 = scalar_lea.hbm %s2242_s10, 256 }
 0x426   : > { %p1723_p4 = scmp.ne.s32.totalorder %s2189_s28, %s1722_s12  ;;  %p1727_p9 = scmp.lt.u32.totalorder %s2189_s28, %s2242_s10 }
 0x427   : > { %p1728_p10 = scmp.lt.u32.totalorder %s1726_s26, %s1722_s12  ;;  %p1730_p12 = scmp.lt.u32.totalorder %s1722_s12, %s2189_s28 }
 0x428   : > { %p1724_p7 = pnand %p1723_p4, %p1870_p5 }
 0x429   : > { %p1729_p11 = por %p1728_p10, %p1727_p9 }
 0x42a   : > { %p1725_p8 = pneg %p1724_p7 }
 0x42b   : > { %p1731_p13 = por %p1730_p12, %p1729_p11 }
 0x42d   : > { %p1732_p0 = pnand %p1731_p13, %p1725_p8 }
 0x42f   : > { %1735 = shalt.err (!%p1732_p0)
}
 0x430   : > { %1611 = dma.vmem_to_hbm [thread:$0]  (%p1870_p5), %s2191_s25, 128, %s2189_s28, %s1457_s29   ;;  %v1610_v55 = vpop.f32.mrb[7].mxu0 }
 0x431 PF: > { %p1617_p1 = scmp.ge.s32.totalorder %s1770_s16, 2  ;;  %s1482_s30 = sand.u32 1, %s1758_s13  }
 0x432   : > { %s1483_s11 = scalar_lea.sflag [#allocation5], %s1482_s30 }
 0x433   : > { %p1614_p2 = pnand %p1617_p1, %p1874_p6 }
 0x435   : > { %1753 = dma.done.wait (!%p1614_p2), %s1483_s11, 128  }
 0x436   : > { %1755 = vsyncadd (!%p1614_p2), %s1483_s11, 4294967168  ;;  %p20_p3 = scmp.ge.s32.totalorder %s1857_s19, 4   ;;  %s2245_s13 = smov %s1762_s14 }
 0x437   : > { %s2246_s14 = smov %s1766_s15  ;;  %s2247_s15 = smov %s1868_s22 }
 0x438   : > { %s2248_s16 = smov %s1857_s19  ;;  %22 = sbr.rel (!%p20_p3) target bundleno = 3 (0x3), region = 109 }
 0x43f   :  { %1488 = vsyncpa [#allocation5], 1 }
 0x440   :  { %1490 = vsyncpa [#allocation5 + $0x1], 1 }

</bundles_post_ra>
